<compile_context>
chip_gen: v7x
topology: tpu7x:2x2x1
jax: 0.10.0
libtpu: 0.0.40
codegen_flags: <defaults>
</compile_context>

<pallas_src>
import functools

import numpy as np
import jax
import jax.numpy as jnp
from jax.experimental import pallas as pl
from jax.experimental.pallas import tpu as pltpu


def _round_up(n, m):
    return ((n + m - 1) // m) * m


def _pick_batch_tile(B):
    """Batch tile: <= 256 rows, multiple of 8; B gets padded up to a multiple."""
    cap = 256
    if B <= cap:
        return _round_up(B, 8)
    n_tiles = -(-B // cap)                      # cdiv
    return _round_up(-(-B // n_tiles), 8)       # roughly equal tiles, 8-aligned


def dueling_dqn_kernel(x_ref, we_ref, be_ref, w1_ref, b1_ref,
                       wa1_ref, ba1_ref, wa2_ref, ba2_ref, q_ref):
    """One batch tile.  x_ref holds [state | goal] packed along the feature axis."""
    bf16 = jnp.bfloat16

    # Block-diagonal embedding: sg_ft = [relu(s@We+be), relu(g@We+be)] in one dot.
    x = x_ref[...]                                                    # (tb, 256) bf16
    sg_ft = jnp.maximum(
        jnp.dot(x, we_ref[...], preferred_element_type=jnp.float32)
        + be_ref[...], 0.0)                                           # (tb, 512) f32

    # _ff_block: relu(linear1(x)) + x   (bf16 MXU inputs, f32 elementwise)
    h = jnp.maximum(
        jnp.dot(sg_ft.astype(bf16), w1_ref[...],
                preferred_element_type=jnp.float32) + b1_ref[...], 0.0)
    feature = (h + sg_ft).astype(bf16)                                # (tb, 512)

    # Advantage head: Linear(512,1024) + ReLU + Linear(1024, ACT_PAD)
    a1 = jnp.maximum(
        jnp.dot(feature, wa1_ref[...],
                preferred_element_type=jnp.float32) + ba1_ref[...], 0.0)
    q = jnp.dot(a1.astype(bf16), wa2_ref[...],
                preferred_element_type=jnp.float32) + ba2_ref[...]    # (tb, ACT_PAD)

    q_ref[...] = q.astype(q_ref.dtype)


def prepare_params(params, obs_flat, action_dim):
    """One-time prep: block-diagonal embedding, lane padding, bf16 weight cast."""
    obs_pad = _round_up(obs_flat, 128)
    act_pad = _round_up(action_dim, 128)
    emb_dim = params["we"].shape[1]                          # 256

    # Block-diagonal embedding weight: (2*obs_pad, 2*emb_dim) = (256, 512).
    we = params["we"].astype(jnp.float32)                    # (obs_flat, 256)
    we_bd = jnp.zeros((2 * obs_pad, 2 * emb_dim), jnp.float32)
    we_bd = we_bd.at[:obs_flat, :emb_dim].set(we)
    we_bd = we_bd.at[obs_pad:obs_pad + obs_flat, emb_dim:].set(we)
    be_bd = jnp.concatenate([params["be"], params["be"]], axis=1)    # (1, 512)

    wa2 = jnp.pad(params["wa2"], ((0, 0), (0, act_pad - action_dim)))
    ba2 = jnp.pad(params["ba2"], ((0, 0), (0, act_pad - action_dim)))

    return dict(
        we_bd=we_bd.astype(jnp.bfloat16), be_bd=be_bd,
        w1=params["w1"].astype(jnp.bfloat16), b1=params["b1"],
        wa1=params["wa1"].astype(jnp.bfloat16), ba1=params["ba1"],
        wa2=wa2.astype(jnp.bfloat16), ba2=ba2,
    )


@functools.partial(jax.jit, static_argnames=("action_dim",))
def dueling_dqn_forward(state, goal, prep, *, action_dim):
    """state, goal: (B, *obs_dim). Returns q: (B, action_dim) float32."""
    B = state.shape[0]
    obs_flat = int(np.prod(state.shape[1:]))
    in_pad = prep["we_bd"].shape[0]       # 2*obs_pad (256)
    obs_pad = in_pad // 2                 # 128
    sg_dim = prep["we_bd"].shape[1]       # 512
    ff_dim = prep["w1"].shape[1]          # 512
    adv_dim = prep["wa1"].shape[1]        # 1024
    act_pad = prep["wa2"].shape[1]        # 128

    tb = _pick_batch_tile(B)
    B_pad = _round_up(B, tb)
    nb = B_pad // tb

    # Single-pass input prep: pack [state | goal] on the feature axis with the
    # zero-pad folded into the same concatenate, cast straight to bf16.
    s = state.reshape(B, obs_flat)
    g = goal.reshape(B, obs_flat)
    zcol = jnp.zeros((B, obs_pad - obs_flat), s.dtype)
    x = jnp.concatenate([s, zcol, g, zcol], axis=1).astype(jnp.bfloat16)  # (B, 256)
    if B_pad > B:
        x = jnp.pad(x, ((0, B_pad - B), (0, 0)))

    def w_spec(shape):
        return pl.BlockSpec(shape, lambda i: (0, 0))

    q_pad = pl.pallas_call(
        dueling_dqn_kernel,
        out_shape=jax.ShapeDtypeStruct((B_pad, act_pad), jnp.float32),
        grid=(nb,),
        in_specs=[
            pl.BlockSpec((tb, in_pad), lambda i: (i, 0)),    # packed [state|goal]
            w_spec((in_pad, sg_dim)), w_spec((1, sg_dim)),   # block-diag embed
            w_spec((ff_dim, ff_dim)), w_spec((1, ff_dim)),   # linear1
            w_spec((ff_dim, adv_dim)), w_spec((1, adv_dim)), # advantage L1
            w_spec((adv_dim, act_pad)), w_spec((1, act_pad)),# advantage L2
        ],
        out_specs=pl.BlockSpec((tb, act_pad), lambda i: (i, 0)),
        compiler_params=pltpu.CompilerParams(
            dimension_semantics=("parallel",)),
    )(x, prep["we_bd"], prep["be_bd"], prep["w1"], prep["b1"],
      prep["wa1"], prep["ba1"], prep["wa2"], prep["ba2"])

    # Pallas stores the lane-dense (B_pad, 128) slab; slice back to the module's
    # exact output shape.  (Callers that tolerate the zero-padded 128 lanes can
    # consume q_pad directly and skip this extra HBM pass.)
    return q_pad[:B, :action_dim]


def init_params(key, obs_flat, action_dim):
    """Deterministic synthetic init; weights stored as (in, out), f32."""
    ks = jax.random.split(key, 8)

    def lin(kw, kb, fan_in, fan_out):
        bound = 1.0 / np.sqrt(fan_in)
        w = jax.random.uniform(kw, (fan_in, fan_out), jnp.float32, -bound, bound)
        b = jax.random.uniform(kb, (1, fan_out), jnp.float32, -bound, bound)
        return w, b

    we, be = lin(ks[0], ks[1], obs_flat, 256)
    w1, b1 = lin(ks[2], ks[3], 512, 512)
    wa1, ba1 = lin(ks[4], ks[5], 512, 1024)
    wa2, ba2 = lin(ks[6], ks[7], 1024, action_dim)
    return dict(we=we, be=be, w1=w1, b1=b1, wa1=wa1, ba1=ba1, wa2=wa2, ba2=ba2)


def reference_forward_f32(state, goal, params):
    """Pure-f32 JAX reference of the PyTorch forward."""
    B = state.shape[0]
    s = state.reshape(B, -1)
    g = goal.reshape(B, -1)
    s_ft = jnp.maximum(s @ params["we"] + params["be"], 0.0)
    g_ft = jnp.maximum(g @ params["we"] + params["be"], 0.0)
    sg = jnp.concatenate([s_ft, g_ft], axis=1)
    feat = jnp.maximum(sg @ params["w1"] + params["b1"], 0.0) + sg
    a1 = jnp.maximum(feat @ params["wa1"] + params["ba1"], 0.0)
    return a1 @ params["wa2"] + params["ba2"]


def reference_forward_bf16(state, goal, params):
    """Numerical mirror of the kernel: bf16 matmul inputs, f32 accumulate."""
    bf = jnp.bfloat16

    def dot(x, w):
        return jnp.dot(x.astype(bf), w.astype(bf),
                       preferred_element_type=jnp.float32)

    B = state.shape[0]
    s = state.reshape(B, -1)
    g = goal.reshape(B, -1)
    s_ft = jnp.maximum(dot(s, params["we"]) + params["be"], 0.0)
    g_ft = jnp.maximum(dot(g, params["we"]) + params["be"], 0.0)
    sg = jnp.concatenate([s_ft, g_ft], axis=1)
    feat = jnp.maximum(dot(sg, params["w1"]) + params["b1"], 0.0) + sg
    a1 = jnp.maximum(dot(feat, params["wa1"]) + params["ba1"], 0.0)
    return dot(a1, params["wa2"]) + params["ba2"]


if __name__ == "__main__":
    # Shapes consistent with the module: obs_dim=(5,10) rack grid, batch=2,
    # action_dim=100.  num_classes is unused in forward().
    B = 2
    obs_dim = (5, 10)
    obs_flat = int(np.prod(obs_dim))
    action_dim = 100

    key = jax.random.PRNGKey(0)
    k_state, k_goal, k_params = jax.random.split(key, 3)

    state = jax.random.normal(k_state, (B,) + obs_dim, dtype=jnp.float32)
    goal = jax.random.normal(k_goal, (B,) + obs_dim, dtype=jnp.float32)
    params = init_params(k_params, obs_flat, action_dim)
    prep = prepare_params(params, obs_flat, action_dim)

    q = dueling_dqn_forward(state, goal, prep, action_dim=action_dim)
    q = jax.block_until_ready(q)
    assert q.shape == (B, action_dim)

    # Tight check against an exact numerical mirror (bf16 weights/inputs,
    # f32 accumulation), then a loose check against the pure-f32 module.
    q_bf16 = reference_forward_bf16(state, goal, params)
    np.testing.assert_allclose(np.asarray(q), np.asarray(q_bf16),
                               rtol=2e-3, atol=2e-3)

    q_f32 = reference_forward_f32(state, goal, params)
    np.testing.assert_allclose(np.asarray(q), np.asarray(q_f32),
                               rtol=5e-2, atol=5e-2)

    print("KERNEL_OK")
</pallas_src>

<mosaic_0001>
module attributes {stable_mosaic.version = 11 : i64} {
  func.func @dueling_dqn_kernel(%arg0: i32, %arg1: memref<8x256xbf16, #tpu.memory_space<vmem>>, %arg2: memref<256x512xbf16, #tpu.memory_space<vmem>>, %arg3: memref<1x512xf32, #tpu.memory_space<vmem>>, %arg4: memref<512x512xbf16, #tpu.memory_space<vmem>>, %arg5: memref<1x512xf32, #tpu.memory_space<vmem>>, %arg6: memref<512x1024xbf16, #tpu.memory_space<vmem>>, %arg7: memref<1x1024xf32, #tpu.memory_space<vmem>>, %arg8: memref<1024x128xbf16, #tpu.memory_space<vmem>>, %arg9: memref<1x128xf32, #tpu.memory_space<vmem>>, %arg10: memref<8x128xf32, #tpu.memory_space<vmem>>) attributes {dimension_semantics = [#tpu.dimension_semantics<parallel>], iteration_bounds = array<i64: 1>, scalar_prefetch = 0 : i64, scratch_operands = 0 : i64, tpu.core_type = #tpu.core_type<tc>, window_params = [{transform_indices = @transform_0, window_bounds = array<i64: 8, 256>}, {pipeline_mode = #tpu.pipeline_mode<synchronous>, transform_indices = @transform_1, window_bounds = array<i64: 256, 512>}, {pipeline_mode = #tpu.pipeline_mode<synchronous>, transform_indices = @transform_2, window_bounds = array<i64: 1, 512>}, {pipeline_mode = #tpu.pipeline_mode<synchronous>, transform_indices = @transform_3, window_bounds = array<i64: 512, 512>}, {pipeline_mode = #tpu.pipeline_mode<synchronous>, transform_indices = @transform_4, window_bounds = array<i64: 1, 512>}, {pipeline_mode = #tpu.pipeline_mode<synchronous>, transform_indices = @transform_5, window_bounds = array<i64: 512, 1024>}, {pipeline_mode = #tpu.pipeline_mode<synchronous>, transform_indices = @transform_6, window_bounds = array<i64: 1, 1024>}, {pipeline_mode = #tpu.pipeline_mode<synchronous>, transform_indices = @transform_7, window_bounds = array<i64: 1024, 128>}, {pipeline_mode = #tpu.pipeline_mode<synchronous>, transform_indices = @transform_8, window_bounds = array<i64: 1, 128>}, {transform_indices = @transform_9, window_bounds = array<i64: 8, 128>}]} {
    %c0 = arith.constant 0 : index
    %c0_0 = arith.constant 0 : index
    %0 = vector.load %arg1[%c0, %c0_0] : memref<8x256xbf16, #tpu.memory_space<vmem>>, vector<8x256xbf16>
    %c0_1 = arith.constant 0 : index
    %c0_2 = arith.constant 0 : index
    %1 = vector.load %arg2[%c0_1, %c0_2] : memref<256x512xbf16, #tpu.memory_space<vmem>>, vector<256x512xbf16>
    %cst = arith.constant dense<0.000000e+00> : vector<8x512xf32>
    %2 = tpu.matmul %0, %1, %cst {dimension_numbers = #tpu.dot_dimension_numbers<[1], [0], [0], [1], [0, 0, 1, 1], [], []>} : vector<8x256xbf16>, vector<256x512xbf16>, vector<8x512xf32> -> vector<8x512xf32>
    %c0_3 = arith.constant 0 : index
    %c0_4 = arith.constant 0 : index
    %3 = vector.load %arg3[%c0_3, %c0_4] : memref<1x512xf32, #tpu.memory_space<vmem>>, vector<1x512xf32>
    %4 = vector.broadcast %3 : vector<1x512xf32> to vector<8x512xf32>
    %5 = arith.addf %2, %4 : vector<8x512xf32>
    %cst_5 = arith.constant 0.000000e+00 : f32
    %6 = vector.broadcast %cst_5 : f32 to vector<8x512xf32>
    %7 = arith.maximumf %5, %6 : vector<8x512xf32>
    %8 = arith.truncf %7 : vector<8x512xf32> to vector<8x512xbf16>
    %c0_6 = arith.constant 0 : index
    %c0_7 = arith.constant 0 : index
    %9 = vector.load %arg4[%c0_6, %c0_7] : memref<512x512xbf16, #tpu.memory_space<vmem>>, vector<512x512xbf16>
    %cst_8 = arith.constant dense<0.000000e+00> : vector<8x512xf32>
    %10 = tpu.matmul %8, %9, %cst_8 {dimension_numbers = #tpu.dot_dimension_numbers<[1], [0], [0], [1], [0, 0, 1, 1], [], []>} : vector<8x512xbf16>, vector<512x512xbf16>, vector<8x512xf32> -> vector<8x512xf32>
    %c0_9 = arith.constant 0 : index
    %c0_10 = arith.constant 0 : index
    %11 = vector.load %arg5[%c0_9, %c0_10] : memref<1x512xf32, #tpu.memory_space<vmem>>, vector<1x512xf32>
    %12 = vector.broadcast %11 : vector<1x512xf32> to vector<8x512xf32>
    %13 = arith.addf %10, %12 : vector<8x512xf32>
    %cst_11 = arith.constant 0.000000e+00 : f32
    %14 = vector.broadcast %cst_11 : f32 to vector<8x512xf32>
    %15 = arith.maximumf %13, %14 : vector<8x512xf32>
    %16 = arith.addf %15, %7 : vector<8x512xf32>
    %17 = arith.truncf %16 : vector<8x512xf32> to vector<8x512xbf16>
    %c0_12 = arith.constant 0 : index
    %c0_13 = arith.constant 0 : index
    %18 = vector.load %arg6[%c0_12, %c0_13] : memref<512x1024xbf16, #tpu.memory_space<vmem>>, vector<512x1024xbf16>
    %cst_14 = arith.constant dense<0.000000e+00> : vector<8x1024xf32>
    %19 = tpu.matmul %17, %18, %cst_14 {dimension_numbers = #tpu.dot_dimension_numbers<[1], [0], [0], [1], [0, 0, 1, 1], [], []>} : vector<8x512xbf16>, vector<512x1024xbf16>, vector<8x1024xf32> -> vector<8x1024xf32>
    %c0_15 = arith.constant 0 : index
    %c0_16 = arith.constant 0 : index
    %20 = vector.load %arg7[%c0_15, %c0_16] : memref<1x1024xf32, #tpu.memory_space<vmem>>, vector<1x1024xf32>
    %21 = vector.broadcast %20 : vector<1x1024xf32> to vector<8x1024xf32>
    %22 = arith.addf %19, %21 : vector<8x1024xf32>
    %cst_17 = arith.constant 0.000000e+00 : f32
    %23 = vector.broadcast %cst_17 : f32 to vector<8x1024xf32>
    %24 = arith.maximumf %22, %23 : vector<8x1024xf32>
    %25 = arith.truncf %24 : vector<8x1024xf32> to vector<8x1024xbf16>
    %c0_18 = arith.constant 0 : index
    %c0_19 = arith.constant 0 : index
    %26 = vector.load %arg8[%c0_18, %c0_19] : memref<1024x128xbf16, #tpu.memory_space<vmem>>, vector<1024x128xbf16>
    %cst_20 = arith.constant dense<0.000000e+00> : vector<8x128xf32>
    %27 = tpu.matmul %25, %26, %cst_20 {dimension_numbers = #tpu.dot_dimension_numbers<[1], [0], [0], [1], [0, 0, 1, 1], [], []>} : vector<8x1024xbf16>, vector<1024x128xbf16>, vector<8x128xf32> -> vector<8x128xf32>
    %c0_21 = arith.constant 0 : index
    %c0_22 = arith.constant 0 : index
    %28 = vector.load %arg9[%c0_21, %c0_22] : memref<1x128xf32, #tpu.memory_space<vmem>>, vector<1x128xf32>
    %29 = vector.broadcast %28 : vector<1x128xf32> to vector<8x128xf32>
    %30 = arith.addf %27, %29 : vector<8x128xf32>
    %c0_23 = arith.constant 0 : index
    %c0_24 = arith.constant 0 : index
    %31 = vector.load %arg10[%c0_23, %c0_24] : memref<8x128xf32, #tpu.memory_space<vmem>>, vector<8x128xf32>
    tpu.vector_store %arg10[%c0_23, %c0_24], %30 {strides = array<i32>} : memref<8x128xf32, #tpu.memory_space<vmem>>, vector<8x128xf32>,
    return
  }
  func.func @transform_0(%arg0: i32) -> (i32, i32) {
    %c0_i32 = arith.constant 0 : i32
    %c0_i32_0 = arith.constant 0 : i32
    return %arg0, %c0_i32 : i32, i32
  }
  func.func @transform_1(%arg0: i32) -> (i32, i32) {
    %c0_i32 = arith.constant 0 : i32
    %c0_i32_0 = arith.constant 0 : i32
    %c0_i32_1 = arith.constant 0 : i32
    return %c0_i32, %c0_i32_0 : i32, i32
  }
  func.func @transform_2(%arg0: i32) -> (i32, i32) {
    %c0_i32 = arith.constant 0 : i32
    %c0_i32_0 = arith.constant 0 : i32
    %c0_i32_1 = arith.constant 0 : i32
    return %c0_i32, %c0_i32_0 : i32, i32
  }
  func.func @transform_3(%arg0: i32) -> (i32, i32) {
    %c0_i32 = arith.constant 0 : i32
    %c0_i32_0 = arith.constant 0 : i32
    %c0_i32_1 = arith.constant 0 : i32
    return %c0_i32, %c0_i32_0 : i32, i32
  }
  func.func @transform_4(%arg0: i32) -> (i32, i32) {
    %c0_i32 = arith.constant 0 : i32
    %c0_i32_0 = arith.constant 0 : i32
    %c0_i32_1 = arith.constant 0 : i32
    return %c0_i32, %c0_i32_0 : i32, i32
  }
  func.func @transform_5(%arg0: i32) -> (i32, i32) {
    %c0_i32 = arith.constant 0 : i32
    %c0_i32_0 = arith.constant 0 : i32
    %c0_i32_1 = arith.constant 0 : i32
    return %c0_i32, %c0_i32_0 : i32, i32
  }
  func.func @transform_6(%arg0: i32) -> (i32, i32) {
    %c0_i32 = arith.constant 0 : i32
    %c0_i32_0 = arith.constant 0 : i32
    %c0_i32_1 = arith.constant 0 : i32
    return %c0_i32, %c0_i32_0 : i32, i32
  }
  func.func @transform_7(%arg0: i32) -> (i32, i32) {
    %c0_i32 = arith.constant 0 : i32
    %c0_i32_0 = arith.constant 0 : i32
    %c0_i32_1 = arith.constant 0 : i32
    return %c0_i32, %c0_i32_0 : i32, i32
  }
  func.func @transform_8(%arg0: i32) -> (i32, i32) {
    %c0_i32 = arith.constant 0 : i32
    %c0_i32_0 = arith.constant 0 : i32
    %c0_i32_1 = arith.constant 0 : i32
    return %c0_i32, %c0_i32_0 : i32, i32
  }
  func.func @transform_9(%arg0: i32) -> (i32, i32) {
    %c0_i32 = arith.constant 0 : i32
    %c0_i32_0 = arith.constant 0 : i32
    return %arg0, %c0_i32 : i32, i32
  }
}

</mosaic_0001>

<bundles_post_ra>
// kernel: dueling_dqn_forward.1
= control target key start
LH: loop header
LB: loop body
LE: loop exit
PB: predicated region body
PF: predicated region fallthrough
CT: control target
= control target key end

     0   :  { %14 = vsyncpa [#allocation3], 0  ;;  %s5505_s0 = inlined_call_operand.vmem [shape: bf16[8,256], index: 0, kind: input, shape index: {}]   ;;  %s5506_s1 = inlined_call_operand.hbm [shape: bf16[256,512], index: 1, kind: input, shape index: {}]   ;;  %s5507_s2 = inlined_call_operand.vmem [shape: f32[1,512], index: 2, kind: input, shape index: {}]   ;;  %s5508_s3 = inlined_call_operand.hbm [shape: bf16[512,512], index: 3, kind: input, shape index: {}]   ;;  %s5509_s4 = inlined_call_operand.vmem [shape: f32[1,512], index: 4, kind: input, shape index: {}]   ;;  %s5510_s5 = inlined_call_operand.hbm [shape: bf16[512,1024], index: 5, kind: input, shape index: {}]   ;;  %s5511_s6 = inlined_call_operand.vmem [shape: f32[1,1024], index: 6, kind: input, shape index: {}]   ;;  %s5512_s7 = inlined_call_operand.hbm [shape: bf16[1024,128], index: 7, kind: input, shape index: {}]   ;;  %s5513_s8 = inlined_call_operand.vmem [shape: f32[1,128], index: 8, kind: input, shape index: {}]   ;;  %s5514_s9 = inlined_call_operand.vmem [shape: f32[8,128], index: 9, kind: output, shape index: {}]  }
   0x1   :  { %15 = vsyncpa [#allocation5], 0 }
   0x2   :  { %16 = vsyncpa [#allocation8], 0  ;;  %s5264_s30 = smov [#allocation4]   ;;  %s5265_s11 = smov [#allocation2]  }
   0x3   :  { %s38_s10 = sshll.u32 %s5264_s30, 4  ;;  %s24_s12 = sshll.u32 %s5265_s11, 4  ;;  %s39_s10 = int_to_ptr.vmem [resolvable:$true] %s38_s10  ;;  %s5324_s12 = int_to_ptr.vmem [resolvable:$true] %s24_s12 }
   0x4   :  { %s5170_s15 = scalar_lea.hbm %s5508_s3, 16384 }
   0x5   :  { %p5171_p0 = scmp.ne.s32.totalorder %s5508_s3, %s5170_s15  ;;  %p5174_p1 = scmp.lt.u32.totalorder %s5170_s15, %s5508_s3 }
   0x7   :  { %p5176_p2 = pnand %p5174_p1, %p5171_p0 }
   0x9   :  { %5179 = shalt.err (!%p5176_p2)
}
   0xa   :  { %s5180_s20 = scalar_lea.vmem %s39_s10, 16384  ;;  %p5185_p4 = scmp.lt.s32.totalorder %s39_s10, %s39_s10 }
   0xb   :  { %p5181_p3 = scmp.ne.s32.totalorder %s39_s10, %s5180_s20  ;;  %p5186_p5 = scmp.lt.s32.totalorder %s5180_s20, %s5180_s20 }
   0xd   :  { %p5187_p6 = por %p5186_p5, %p5185_p4 }
   0xf   :  { %p5188_p7 = pnand %p5187_p6, %p5181_p3 }
  0x11   :  { %5191 = shalt.err (!%p5188_p7)
}
  0x12   :  { %s5266_s21 = smov 256   ;;  %s5267_s22 = smov 16  }
  0x13   :  { %44 = dma.hbm_to_vmem [thread:$0]  %s5508_s3, 16384, %s39_s10, [#allocation5], %s5266_s21, %s5266_s21, %s5267_s22  }
  0x14   :  { %s5192_s27 = scalar_lea.hbm %s5506_s1, 8192 }
  0x15   :  { %p5193_p8 = scmp.ne.s32.totalorder %s5506_s1, %s5192_s27  ;;  %p5196_p9 = scmp.lt.u32.totalorder %s5192_s27, %s5506_s1 }
  0x17   :  { %p5198_p10 = pnand %p5196_p9, %p5193_p8 }
  0x19   :  { %5201 = shalt.err (!%p5198_p10)
}
  0x1a   :  { %s5202_s13 = scalar_lea.vmem %s5324_s12, 8192  ;;  %p5207_p12 = scmp.lt.s32.totalorder %s5324_s12, %s5324_s12 }
  0x1b   :  { %p5203_p11 = scmp.ne.s32.totalorder %s5324_s12, %s5202_s13  ;;  %p5208_p13 = scmp.lt.s32.totalorder %s5202_s13, %s5202_s13 }
  0x1d   :  { %p5209_p0 = por %p5208_p13, %p5207_p12 }
  0x1f   :  { %p5210_p1 = pnand %p5209_p0, %p5203_p11 }
  0x21   :  { %5213 = shalt.err (!%p5210_p1)
}
  0x22   :  { %30 = dma.hbm_to_vmem [thread:$0]  %s5506_s1, 8192, %s5324_s12, [#allocation3], %s5266_s21, %s5266_s21, %s5267_s22  }
  0x23   :  { %s5268_s14 = smov [#allocation6]   ;;  %s5214_s18 = scalar_lea.hbm %s5510_s5, 32768 }
  0x24   :  { %s52_s15 = sshll.u32 %s5268_s14, 4  ;;  %p5215_p2 = scmp.ne.s32.totalorder %s5510_s5, %s5214_s18  ;;  %s53_s15 = int_to_ptr.vmem [resolvable:$true] %s52_s15 }
  0x25   :  { %p5218_p3 = scmp.lt.u32.totalorder %s5214_s18, %s5510_s5 }
  0x27   :  { %p5220_p4 = pnand %p5218_p3, %p5215_p2 }
  0x29   :  { %5223 = shalt.err (!%p5220_p4)
}
  0x2a   :  { %s5224_s25 = scalar_lea.vmem %s53_s15, 32768  ;;  %p5229_p6 = scmp.lt.s32.totalorder %s53_s15, %s53_s15 }
  0x2b   :  { %p5225_p5 = scmp.ne.s32.totalorder %s53_s15, %s5224_s25  ;;  %p5230_p7 = scmp.lt.s32.totalorder %s5224_s25, %s5224_s25 }
  0x2d   :  { %p5231_p8 = por %p5230_p7, %p5229_p6 }
  0x2f   :  { %p5232_p9 = pnand %p5231_p8, %p5225_p5 }
  0x31   :  { %5235 = shalt.err (!%p5232_p9)
}
  0x32   :  { %s5269_s1 = smov 512   ;;  %s5270_s12 = smov 32  }
  0x33   :  { %58 = dma.hbm_to_vmem [thread:$0]  %s5510_s5, 32768, %s53_s15, [#allocation5], %s5269_s1, %s5269_s1, %s5270_s12  }
  0x34   :  { %s5271_s26 = smov [#allocation7]   ;;  %s5236_s30 = scalar_lea.hbm %s5512_s7, 8192 }
  0x35   :  { %s66_s27 = sshll.u32 %s5271_s26, 4  ;;  %p5237_p10 = scmp.ne.s32.totalorder %s5512_s7, %s5236_s30  ;;  %s67_s27 = int_to_ptr.vmem [resolvable:$true] %s66_s27 }
  0x36   :  { %p5240_p11 = scmp.lt.u32.totalorder %s5236_s30, %s5512_s7 }
  0x38   :  { %p5242_p12 = pnand %p5240_p11, %p5237_p10 }
  0x3a   :  { %5245 = shalt.err (!%p5242_p12)
}
  0x3b   :  { %s5246_s14 = scalar_lea.vmem %s67_s27, 8192  ;;  %p5251_p0 = scmp.lt.s32.totalorder %s67_s27, %s67_s27 }
  0x3c   :  { %p5247_p13 = scmp.ne.s32.totalorder %s67_s27, %s5246_s14  ;;  %p5252_p1 = scmp.lt.s32.totalorder %s5246_s14, %s5246_s14 }
  0x3e   :  { %p5253_p2 = por %p5252_p1, %p5251_p0 }
  0x40   :  { %p5254_p3 = pnand %p5253_p2, %p5247_p13 }
  0x42   :  { %5257 = shalt.err (!%p5254_p3)
}
  0x43   :  { %s5272_s5 = smov 64   ;;  %s5273_s15 = smov 4  }
  0x44   :  { %72 = dma.hbm_to_vmem [thread:$0]  %s5512_s7, 8192, %s67_s27, [#allocation8], %s5272_s5, %s5272_s5, %s5273_s15  }
  0x45   :  { %5258 = dma.done.wait [#allocation3], 8192  }
  0x46   :  { %5259 = vsyncadd [#allocation3], 4294959104 }
  0x47   :  { %5260 = dma.done.wait [#allocation5], 49152  }
  0x48   :  { %5261 = vsyncadd [#allocation5], 4294918144 }
  0x49   :  { %5262 = dma.done.wait [#allocation8], 8192  }
  0x4a   :  { %5263 = vsyncadd [#allocation8], 4294959104  ;;  %v4816_v0 = vld [vmem:[#allocation2 + $0x4] ss:$16 sps:$4 sm:$0xff]   ;;  %v4818_v1 = vld [vmem:[#allocation2] ss:$16 sps:$4 sm:$0xff]  }
  0x4b   :  { %502 = vmatprep.subr.bf16.mxu0 %v4816_v0  ;;  %v4819_v2 = vld [vmem:[#allocation2 + $0x24] ss:$16 sps:$4 sm:$0xff]   ;;  %v4821_v3 = vld [vmem:[#allocation2 + $0x20] ss:$16 sps:$4 sm:$0xff]   ;;  %v4863_v14 = vld [vmem:[#allocation2 + $0xc] ss:$16 sps:$4 sm:$0xff]  }
  0x4c   :  { %503 = vmatpush1.bf16.msra.mxu0 %v4818_v1  ;;  %v4822_v4 = vld [vmem:[#allocation2 + $0x44] ss:$16 sps:$4 sm:$0xff]   ;;  %v4824_v5 = vld [vmem:[#allocation2 + $0x40] ss:$16 sps:$4 sm:$0xff]   ;;  %v4866_v16 = vld [vmem:[#allocation2 + $0x8] ss:$16 sps:$4 sm:$0xff]   ;;  %543 = vmatprep.subr.bf16.mxu1 %v4863_v14 }
  0x4d   :  { %504 = vmatprep.subr.bf16.mxu0 %v4819_v2  ;;  %v4825_v6 = vld [vmem:[#allocation2 + $0x64] ss:$16 sps:$4 sm:$0xff]   ;;  %v4827_v7 = vld [vmem:[#allocation2 + $0x60] ss:$16 sps:$4 sm:$0xff]   ;;  %v4869_v19 = vld [vmem:[#allocation2 + $0x2c] ss:$16 sps:$4 sm:$0xff]   ;;  %544 = vmatpush1.bf16.msra.mxu1 %v4866_v16 }
  0x4e   :  { %v4828_v8 = vld [vmem:[#allocation2 + $0x84] ss:$16 sps:$4 sm:$0xff]   ;;  %v4830_v9 = vld [vmem:[#allocation2 + $0x80] ss:$16 sps:$4 sm:$0xff]   ;;  %v4871_v20 = vld [vmem:[#allocation2 + $0x28] ss:$16 sps:$4 sm:$0xff]   ;;  %545 = vmatprep.subr.bf16.mxu1 %v4869_v19 }
  0x4f   :  { %v4831_v10 = vld [vmem:[#allocation2 + $0xa4] ss:$16 sps:$4 sm:$0xff]   ;;  %v4833_v11 = vld [vmem:[#allocation2 + $0xa0] ss:$16 sps:$4 sm:$0xff]   ;;  %v4872_v21 = vld [vmem:[#allocation2 + $0x4c] ss:$16 sps:$4 sm:$0xff]  }
  0x50   :  { %505 = vmatpush1.bf16.msra.mxu0 %v4821_v3  ;;  %v4834_v12 = vld [vmem:[#allocation2 + $0xc4] ss:$16 sps:$4 sm:$0xff]   ;;  %v4836_v13 = vld [vmem:[#allocation2 + $0xc0] ss:$16 sps:$4 sm:$0xff]   ;;  %v4874_v24 = vld [vmem:[#allocation2 + $0x48] ss:$16 sps:$4 sm:$0xff]  }
  0x51   :  { %506 = vmatprep.subr.bf16.mxu0 %v4822_v4  ;;  %v4837_v15 = vld [vmem:[#allocation2 + $0xe4] ss:$16 sps:$4 sm:$0xff]   ;;  %v4839_v22 = vld [vmem:[#allocation2 + $0xe0] ss:$16 sps:$4 sm:$0xff]   ;;  %546 = vmatpush1.bf16.msra.mxu1 %v4871_v20  ;;  %v4875_v25 = vld [vmem:[#allocation2 + $0x6c] ss:$16 sps:$4 sm:$0xff]  }
  0x52   :  { %v5382_v17 = vld [vmem:[%s5505_s0] sm:$0xff]  ;;  %547 = vmatprep.subr.bf16.mxu1 %v4872_v21  ;;  %v4877_v28 = vld [vmem:[#allocation2 + $0x68] ss:$16 sps:$4 sm:$0xff]   ;;  %v4878_v29 = vld [vmem:[#allocation2 + $0x8c] ss:$16 sps:$4 sm:$0xff]  }
  0x53   :  { %v4168_v18 = vcombine.high %v5382_v17, %v5382_v17  ;;  %v4840_v23 = vld [vmem:[#allocation2 + $0x104] ss:$16 sps:$4 sm:$0xff]   ;;  %v4842_v26 = vld [vmem:[#allocation2 + $0x100] ss:$16 sps:$4 sm:$0xff]   ;;  %v4880_v32 = vld [vmem:[#allocation2 + $0x88] ss:$16 sps:$4 sm:$0xff]   ;;  %v4167_v58 = vcombine.low %v5382_v17, %v5382_v17 }
  0x54   :  { %507 = vmatpush1.bf16.msra.mxu0 %v4824_v5  ;;  %v4843_v27 = vld [vmem:[#allocation2 + $0x124] ss:$16 sps:$4 sm:$0xff]   ;;  %v4845_v30 = vld [vmem:[#allocation2 + $0x120] ss:$16 sps:$4 sm:$0xff]   ;;  %v4881_v33 = vld [vmem:[#allocation2 + $0xac] ss:$16 sps:$4 sm:$0xff]  }
  0x55   :  { %508 = vmatprep.subr.bf16.mxu0 %v4825_v6  ;;  %534 = vmatprep.mubr.bf16.mxu0 %v4168_v18  ;;  %v4846_v31 = vld [vmem:[#allocation2 + $0x144] ss:$16 sps:$4 sm:$0xff]   ;;  %v4848_v34 = vld [vmem:[#allocation2 + $0x140] ss:$16 sps:$4 sm:$0xff]   ;;  %v4883_v36 = vld [vmem:[#allocation2 + $0xa8] ss:$16 sps:$4 sm:$0xff]  }
  0x56   :  { %575 = vmatprep.mubr.bf16.mxu1 %v4168_v18  ;;  %548 = vmatpush1.bf16.msra.mxu1 %v4874_v24  ;;  %v4849_v35 = vld [vmem:[#allocation2 + $0x164] ss:$16 sps:$4 sm:$0xff]   ;;  %v4884_v37 = vld [vmem:[#allocation2 + $0xcc] ss:$16 sps:$4 sm:$0xff]   ;;  %v4851_v38 = vld [vmem:[#allocation2 + $0x160] ss:$16 sps:$4 sm:$0xff]  }
  0x57   :  { %549 = vmatprep.subr.bf16.mxu1 %v4875_v25  ;;  %v4852_v39 = vld [vmem:[#allocation2 + $0x184] ss:$16 sps:$4 sm:$0xff]   ;;  %v4886_v40 = vld [vmem:[#allocation2 + $0xc8] ss:$16 sps:$4 sm:$0xff]   ;;  %v4887_v41 = vld [vmem:[#allocation2 + $0xec] ss:$16 sps:$4 sm:$0xff]  }
  0x58   :  { %509 = vmatpush1.bf16.msra.mxu0 %v4827_v7  ;;  %v4854_v42 = vld [vmem:[#allocation2 + $0x180] ss:$16 sps:$4 sm:$0xff]   ;;  %v4855_v43 = vld [vmem:[#allocation2 + $0x1a4] ss:$16 sps:$4 sm:$0xff]   ;;  %v4889_v44 = vld [vmem:[#allocation2 + $0xe8] ss:$16 sps:$4 sm:$0xff]  }
  0x59   :  { %510 = vmatprep.subr.bf16.mxu0 %v4828_v8  ;;  %v4890_v45 = vld [vmem:[#allocation2 + $0x10c] ss:$16 sps:$4 sm:$0xff]   ;;  %v4857_v46 = vld [vmem:[#allocation2 + $0x1a0] ss:$16 sps:$4 sm:$0xff]   ;;  %v4858_v47 = vld [vmem:[#allocation2 + $0x1c4] ss:$16 sps:$4 sm:$0xff]  }
  0x5a   :  { %550 = vmatpush1.bf16.msra.mxu1 %v4877_v28  ;;  %v4892_v48 = vld [vmem:[#allocation2 + $0x108] ss:$16 sps:$4 sm:$0xff]   ;;  %v4893_v49 = vld [vmem:[#allocation2 + $0x12c] ss:$16 sps:$4 sm:$0xff]   ;;  %v4860_v50 = vld [vmem:[#allocation2 + $0x1c0] ss:$16 sps:$4 sm:$0xff]  }
  0x5b   :  { %551 = vmatprep.subr.bf16.mxu1 %v4878_v29  ;;  %v4861_v51 = vld [vmem:[#allocation2 + $0x1e4] ss:$16 sps:$4 sm:$0xff]   ;;  %v4895_v52 = vld [vmem:[#allocation2 + $0x128] ss:$16 sps:$4 sm:$0xff]   ;;  %v4896_v53 = vld [vmem:[#allocation2 + $0x14c] ss:$16 sps:$4 sm:$0xff]  }
  0x5c   :  { %511 = vmatpush1.bf16.msra.mxu0 %v4830_v9  ;;  %v4865_v54 = vld [vmem:[#allocation2 + $0x1e0] ss:$16 sps:$4 sm:$0xff]   ;;  %v4898_v55 = vld [vmem:[#allocation2 + $0x148] ss:$16 sps:$4 sm:$0xff]   ;;  %v4916_v56 = vld [vmem:[#allocation4 + $0x4] ss:$16 sps:$4 sm:$0xff]  }
  0x5d   :  { %512 = vmatprep.subr.bf16.mxu0 %v4831_v10  ;;  %v4899_v57 = vld [vmem:[#allocation2 + $0x16c] ss:$16 sps:$4 sm:$0xff]   ;;  %v4901_v59 = vld [vmem:[#allocation2 + $0x168] ss:$16 sps:$4 sm:$0xff]   ;;  %v4914_v60 = vld [vmem:[#allocation4] ss:$16 sps:$4 sm:$0xff]  }
  0x5e   :  { %552 = vmatpush1.bf16.msra.mxu1 %v4880_v32  ;;  %v4922_v61 = vld [vmem:[#allocation4 + $0x24] ss:$16 sps:$4 sm:$0xff]   ;;  %v4902_v62 = vld [vmem:[#allocation2 + $0x18c] ss:$16 sps:$4 sm:$0xff]   ;;  %v4904_v63 = vld [vmem:[#allocation2 + $0x188] ss:$16 sps:$4 sm:$0xff]  }
  0x5f   :  { %553 = vmatprep.subr.bf16.mxu1 %v4881_v33  ;;  %v4920_v0 = vld [vmem:[#allocation4 + $0x20] ss:$16 sps:$4 sm:$0xff]   ;;  %v4928_v1 = vld [vmem:[#allocation4 + $0x44] ss:$16 sps:$4 sm:$0xff]   ;;  %v4905_v2 = vld [vmem:[#allocation2 + $0x1ac] ss:$16 sps:$4 sm:$0xff]  }
  0x60   :  { %513 = vmatpush1.bf16.msra.mxu0 %v4833_v11  ;;  %v4907_v3 = vld [vmem:[#allocation2 + $0x1a8] ss:$16 sps:$4 sm:$0xff]   ;;  %v4926_v4 = vld [vmem:[#allocation4 + $0x40] ss:$16 sps:$4 sm:$0xff]   ;;  %v4934_v5 = vld [vmem:[#allocation4 + $0x64] ss:$16 sps:$4 sm:$0xff]  }
  0x61   :  { %514 = vmatprep.subr.bf16.mxu0 %v4834_v12  ;;  %v4908_v6 = vld [vmem:[#allocation2 + $0x1cc] ss:$16 sps:$4 sm:$0xff]   ;;  %v4910_v7 = vld [vmem:[#allocation2 + $0x1c8] ss:$16 sps:$4 sm:$0xff]   ;;  %v4932_v8 = vld [vmem:[#allocation4 + $0x60] ss:$16 sps:$4 sm:$0xff]  }
  0x62   :  { %554 = vmatpush1.bf16.msra.mxu1 %v4883_v36  ;;  %v4940_v9 = vld [vmem:[#allocation4 + $0x84] ss:$16 sps:$4 sm:$0xff]   ;;  %v4911_v10 = vld [vmem:[#allocation2 + $0x1ec] ss:$16 sps:$4 sm:$0xff]   ;;  %v4913_v11 = vld [vmem:[#allocation2 + $0x1e8] ss:$16 sps:$4 sm:$0xff]  }
  0x63   :  { %555 = vmatprep.subr.bf16.mxu1 %v4884_v37  ;;  %v4938_v12 = vld [vmem:[#allocation4 + $0x80] ss:$16 sps:$4 sm:$0xff]   ;;  %v4946_v14 = vld [vmem:[#allocation4 + $0xa4] ss:$16 sps:$4 sm:$0xff]   ;;  %v4917_v16 = vld [vmem:[#allocation4 + $0x8] ss:$16 sps:$4 sm:$0xff]  }
  0x64   :  { %515 = vmatpush1.bf16.msra.mxu0 %v4836_v13  ;;  %v4919_v13 = vld [vmem:[#allocation4 + $0xc] ss:$16 sps:$4 sm:$0xff]   ;;  %v4952_v17 = vld [vmem:[#allocation4 + $0xc4] ss:$16 sps:$4 sm:$0xff]   ;;  %v4950_v19 = vld [vmem:[#allocation4 + $0xc0] ss:$16 sps:$4 sm:$0xff]  }
  0x65   :  { %516 = vmatprep.subr.bf16.mxu0 %v4837_v15  ;;  %v4944_v15 = vld [vmem:[#allocation4 + $0xa0] ss:$16 sps:$4 sm:$0xff]   ;;  %v4925_v18 = vld [vmem:[#allocation4 + $0x2c] ss:$16 sps:$4 sm:$0xff]   ;;  %v4923_v20 = vld [vmem:[#allocation4 + $0x28] ss:$16 sps:$4 sm:$0xff]  }
  0x66   :  { %556 = vmatpush1.bf16.msra.mxu1 %v4886_v40  ;;  %v4958_v21 = vld [vmem:[#allocation4 + $0xe4] ss:$16 sps:$4 sm:$0xff]   ;;  %v4929_v24 = vld [vmem:[#allocation4 + $0x48] ss:$16 sps:$4 sm:$0xff]  }
  0x67   :  { %557 = vmatprep.subr.bf16.mxu1 %v4887_v41  ;;  %v4964_v25 = vld [vmem:[#allocation4 + $0x104] ss:$16 sps:$4 sm:$0xff]   ;;  %v4935_v28 = vld [vmem:[#allocation4 + $0x68] ss:$16 sps:$4 sm:$0xff]  }
  0x68   :  { %517 = vmatpush1.bf16.msra.mxu0 %v4839_v22  ;;  %v4931_v22 = vld [vmem:[#allocation4 + $0x4c] ss:$16 sps:$4 sm:$0xff]   ;;  %v4970_v29 = vld [vmem:[#allocation4 + $0x124] ss:$16 sps:$4 sm:$0xff]   ;;  %v4941_v32 = vld [vmem:[#allocation4 + $0x88] ss:$16 sps:$4 sm:$0xff]  }
  0x69   :  { %518 = vmatprep.subr.bf16.mxu0 %v4840_v23  ;;  %v4956_v23 = vld [vmem:[#allocation4 + $0xe0] ss:$16 sps:$4 sm:$0xff]   ;;  %v4976_v33 = vld [vmem:[#allocation4 + $0x144] ss:$16 sps:$4 sm:$0xff]   ;;  %v4947_v36 = vld [vmem:[#allocation4 + $0xa8] ss:$16 sps:$4 sm:$0xff]  }
  0x6a   :  { %558 = vmatpush1.bf16.msra.mxu1 %v4889_v44  ;;  %v4982_v37 = vld [vmem:[#allocation4 + $0x164] ss:$16 sps:$4 sm:$0xff]   ;;  %v4953_v40 = vld [vmem:[#allocation4 + $0xc8] ss:$16 sps:$4 sm:$0xff]  }
  0x6b   :  { %559 = vmatprep.subr.bf16.mxu1 %v4890_v45  ;;  %v4988_v41 = vld [vmem:[#allocation4 + $0x184] ss:$16 sps:$4 sm:$0xff]   ;;  %v4959_v44 = vld [vmem:[#allocation4 + $0xe8] ss:$16 sps:$4 sm:$0xff]  }
  0x6c   :  { %519 = vmatpush1.bf16.msra.mxu0 %v4842_v26  ;;  %v4937_v26 = vld [vmem:[#allocation4 + $0x6c] ss:$16 sps:$4 sm:$0xff]   ;;  %v4994_v45 = vld [vmem:[#allocation4 + $0x1a4] ss:$16 sps:$4 sm:$0xff]  }
  0x6d   :  { %520 = vmatprep.subr.bf16.mxu0 %v4843_v27  ;;  %v4962_v27 = vld [vmem:[#allocation4 + $0x100] ss:$16 sps:$4 sm:$0xff]  }
  0x6e   :  { %560 = vmatpush1.bf16.msra.mxu1 %v4892_v48  ;;  %v4965_v48 = vld [vmem:[#allocation4 + $0x108] ss:$16 sps:$4 sm:$0xff]  }
  0x6f   :  { %561 = vmatprep.subr.bf16.mxu1 %v4893_v49  ;;  %v4973_v49 = vld [vmem:[#allocation4 + $0x12c] ss:$16 sps:$4 sm:$0xff]  }
  0x70   :  { %521 = vmatpush1.bf16.msra.mxu0 %v4845_v30  ;;  %v4943_v30 = vld [vmem:[#allocation4 + $0x8c] ss:$16 sps:$4 sm:$0xff]  }
  0x71   :  { %522 = vmatprep.subr.bf16.mxu0 %v4846_v31  ;;  %v4968_v31 = vld [vmem:[#allocation4 + $0x120] ss:$16 sps:$4 sm:$0xff]  }
  0x72   :  { %562 = vmatpush1.bf16.msra.mxu1 %v4895_v52  ;;  %v4977_v52 = vld [vmem:[#allocation4 + $0x148] ss:$16 sps:$4 sm:$0xff]  }
  0x73   :  { %563 = vmatprep.subr.bf16.mxu1 %v4896_v53  ;;  %v4985_v53 = vld [vmem:[#allocation4 + $0x16c] ss:$16 sps:$4 sm:$0xff]  }
  0x74   :  { %523 = vmatpush1.bf16.msra.mxu0 %v4848_v34  ;;  %v4949_v34 = vld [vmem:[#allocation4 + $0xac] ss:$16 sps:$4 sm:$0xff]  }
  0x75   :  { %524 = vmatprep.subr.bf16.mxu0 %v4849_v35  ;;  %v4974_v35 = vld [vmem:[#allocation4 + $0x140] ss:$16 sps:$4 sm:$0xff]  }
  0x76   :  { %564 = vmatpush1.bf16.msra.mxu1 %v4898_v55  ;;  %v4991_v55 = vld [vmem:[#allocation4 + $0x18c] ss:$16 sps:$4 sm:$0xff]  }
  0x77   :  { %565 = vmatprep.subr.bf16.mxu1 %v4899_v57  ;;  %v4997_v57 = vld [vmem:[#allocation4 + $0x1ac] ss:$16 sps:$4 sm:$0xff]  }
  0x78   :  { %525 = vmatpush1.bf16.msra.mxu0 %v4851_v38  ;;  %v4955_v38 = vld [vmem:[#allocation4 + $0xcc] ss:$16 sps:$4 sm:$0xff]  }
  0x79   :  { %526 = vmatprep.subr.bf16.mxu0 %v4852_v39  ;;  %v4980_v39 = vld [vmem:[#allocation4 + $0x160] ss:$16 sps:$4 sm:$0xff]  }
  0x7a   :  { %566 = vmatpush1.bf16.msra.mxu1 %v4901_v59  ;;  %v5000_v59 = vld [vmem:[#allocation4 + $0x1c4] ss:$16 sps:$4 sm:$0xff]  }
  0x7b   :  { %567 = vmatprep.subr.bf16.mxu1 %v4902_v62  ;;  %v5001_v62 = vld [vmem:[#allocation4 + $0x1c8] ss:$16 sps:$4 sm:$0xff]  }
  0x7c   :  { %527 = vmatpush1.bf16.msra.mxu0 %v4854_v42  ;;  %v4961_v42 = vld [vmem:[#allocation4 + $0xec] ss:$16 sps:$4 sm:$0xff]  }
  0x7d   :  { %528 = vmatprep.subr.bf16.mxu0 %v4855_v43  ;;  %v4986_v43 = vld [vmem:[#allocation4 + $0x180] ss:$16 sps:$4 sm:$0xff]  }
  0x7e   :  { %568 = vmatpush1.bf16.msra.mxu1 %v4904_v63  ;;  %v5006_v63 = vld [vmem:[#allocation4 + $0x1e4] ss:$16 sps:$4 sm:$0xff]  }
  0x7f   :  { %569 = vmatprep.subr.bf16.mxu1 %v4905_v2  ;;  %v5007_v2 = vld [vmem:[#allocation4 + $0x1e8] ss:$16 sps:$4 sm:$0xff]  }
  0x80   :  { %529 = vmatpush1.bf16.msra.mxu0 %v4857_v46  ;;  %v4967_v46 = vld [vmem:[#allocation4 + $0x10c] ss:$16 sps:$4 sm:$0xff]  }
  0x81   :  { %530 = vmatprep.subr.bf16.mxu0 %v4858_v47  ;;  %v4992_v47 = vld [vmem:[#allocation4 + $0x1a0] ss:$16 sps:$4 sm:$0xff]  }
  0x82   :  { %570 = vmatpush1.bf16.msra.mxu1 %v4907_v3  ;;  %v5012_v3 = vld [vmem:[#allocation4 + $0x204] ss:$16 sps:$4 sm:$0xff]  }
  0x83   :  { %571 = vmatprep.subr.bf16.mxu1 %v4908_v6 }
  0x84   :  { %531 = vmatpush1.bf16.msra.mxu0 %v4860_v50  ;;  %v4971_v50 = vld [vmem:[#allocation4 + $0x128] ss:$16 sps:$4 sm:$0xff]  }
  0x85   :  { %532 = vmatprep.subr.bf16.mxu0 %v4861_v51  ;;  %v4979_v51 = vld [vmem:[#allocation4 + $0x14c] ss:$16 sps:$4 sm:$0xff]  }
  0x86   :  { %572 = vmatpush1.bf16.msra.mxu1 %v4910_v7 }
  0x87   :  { %573 = vmatprep.subr.bf16.mxu1 %v4911_v10 }
  0x88   :  { %533 = vmatpush1.bf16.msra.mxu0 %v4865_v54  ;;  %v4983_v54 = vld [vmem:[#allocation4 + $0x168] ss:$16 sps:$4 sm:$0xff]  }
  0x89   :  { %1382 = vmatprep.subr.bf16.mxu0 %v4916_v56  ;;  %v4989_v56 = vld [vmem:[#allocation4 + $0x188] ss:$16 sps:$4 sm:$0xff]  }
  0x8a   :  { %574 = vmatpush1.bf16.msra.mxu1 %v4913_v11 }
  0x8b   :  { %535 = vmatmul.mubr.bf16.vlgmr.msra.gmra.mrb[0].mxu0 %v4167_v58  ;;  %1464 = vmatprep.subr.bf16.mxu1 %v4919_v13 }
  0x8c   :  { %1383 = vmatpush1.bf16.msra.mxu0 %v4914_v60  ;;  %v5003_v60 = vld [vmem:[#allocation4 + $0x1cc] ss:$16 sps:$4 sm:$0xff]  }
  0x8d   :  { %1384 = vmatprep.subr.bf16.mxu0 %v4922_v61  ;;  %576 = vmatmul.mubr.bf16.vlgmr.msra.gmra.mrb[0].mxu1 %v4167_v58  ;;  %v4995_v58 = vld [vmem:[#allocation4 + $0x1a8] ss:$16 sps:$4 sm:$0xff]   ;;  %v4998_v61 = vld [vmem:[#allocation4 + $0x1c0] ss:$16 sps:$4 sm:$0xff]  }
  0x8e   :  { %1465 = vmatpush1.bf16.msra.mxu1 %v4917_v16 }
  0x8f   :  { %1466 = vmatprep.subr.bf16.mxu1 %v4925_v18 }
  0x90   :  { %1385 = vmatpush1.bf16.msra.mxu0 %v4920_v0  ;;  %v5009_v0 = vld [vmem:[#allocation4 + $0x1ec] ss:$16 sps:$4 sm:$0xff]  }
  0x91   :  { %1386 = vmatprep.subr.bf16.mxu0 %v4928_v1  ;;  %v5004_v1 = vld [vmem:[#allocation4 + $0x1e0] ss:$16 sps:$4 sm:$0xff]  }
  0x92   :  { %1467 = vmatpush1.bf16.msra.mxu1 %v4923_v20 }
  0x93   :  { %1468 = vmatprep.subr.bf16.mxu1 %v4931_v22  ;;  %v5013_v22 = vld [vmem:[#allocation4 + $0x208] ss:$16 sps:$4 sm:$0xff]  }
  0x94   :  { %1387 = vmatpush1.bf16.msra.mxu0 %v4926_v4  ;;  %v5015_v4 = vld [vmem:[#allocation4 + $0x20c] ss:$16 sps:$4 sm:$0xff]  }
  0x95   :  { %1388 = vmatprep.subr.bf16.mxu0 %v4934_v5  ;;  %v155_v5 = vlaneseq }
  0x96   :  { %1469 = vmatpush1.bf16.msra.mxu1 %v4929_v24  ;;  %v5018_v24 = vld [vmem:[#allocation4 + $0x224] ss:$16 sps:$4 sm:$0xff]  }
  0x97   :  { %1470 = vmatprep.subr.bf16.mxu1 %v4937_v26  ;;  %v5388_v6 = vshrl.u32 %v155_v5, 7  ;;  %v5016_v26 = vld [vmem:[#allocation4 + $0x220] ss:$16 sps:$4 sm:$0xff]   ;;  %v5072_v5 = vld [vmem:[#allocation4 + $0x344] ss:$16 sps:$4 sm:$0xff]  }
  0x98   :  { %1389 = vmatpush1.bf16.msra.mxu0 %v4932_v8  ;;  %v5396_v8 = vld [vmem:[%s5507_s2] sm:$0xf] }
  0x99   :  { %1390 = vmatprep.subr.bf16.mxu0 %v4940_v9  ;;  %v5391_v7 = vsub.s32 0, %v5388_v6  ;;  %v5399_v9 = vsub.s32 1, %v5388_v6 }
  0x9a   :  { %1471 = vmatpush1.bf16.msra.mxu1 %v4935_v28  ;;  %v5024_v28 = vld [vmem:[#allocation4 + $0x244] ss:$16 sps:$4 sm:$0xff]  }
  0x9b   :  { %1472 = vmatprep.subr.bf16.mxu1 %v4943_v30  ;;  %v158_v10 = vrot.slane %v5396_v8, %v5391_v7  ;;  %v162_v11 = vrot.slane %v5396_v8, %v5399_v9  ;;  %v5022_v30 = vld [vmem:[#allocation4 + $0x240] ss:$16 sps:$4 sm:$0xff]  }
  0x9c   :  { %1391 = vmatpush1.bf16.msra.mxu0 %v4938_v12 }
  0x9d   :  { %1392 = vmatprep.subr.bf16.mxu0 %v4946_v14 }
  0x9e   :  { %1473 = vmatpush1.bf16.msra.mxu1 %v4941_v32  ;;  %v5030_v32 = vld [vmem:[#allocation4 + $0x264] ss:$16 sps:$4 sm:$0xff]  }
  0x9f   :  { %1474 = vmatprep.subr.bf16.mxu1 %v4949_v34  ;;  %v5414_v34 = vsub.s32 3, %v5388_v6 }
  0xa0   :  { %1393 = vmatpush1.bf16.msra.mxu0 %v4944_v15 }
  0xa1   :  { %1394 = vmatprep.subr.bf16.mxu0 %v4952_v17 }
  0xa2   :  { %1475 = vmatpush1.bf16.msra.mxu1 %v4947_v36  ;;  %v5031_v36 = vld [vmem:[#allocation4 + $0x268] ss:$16 sps:$4 sm:$0xff]  }
  0xa3   :  { %1476 = vmatprep.subr.bf16.mxu1 %v4955_v38  ;;  %v5039_v38 = vld [vmem:[#allocation4 + $0x28c] ss:$16 sps:$4 sm:$0xff]  }
  0xa4   :  { %1395 = vmatpush1.bf16.msra.mxu0 %v4950_v19 }
  0xa5   :  { %1396 = vmatprep.subr.bf16.mxu0 %v4958_v21  ;;  %v5010_v21 = vld [vmem:[#allocation4 + $0x200] ss:$16 sps:$4 sm:$0xff]  }
  0xa6   :  { %1477 = vmatpush1.bf16.msra.mxu1 %v4953_v40 }
  0xa7   :  { %1478 = vmatprep.subr.bf16.mxu1 %v4961_v42  ;;  %v5037_v42 = vld [vmem:[#allocation4 + $0x288] ss:$16 sps:$4 sm:$0xff]  }
  0xa8   :  { %1397 = vmatpush1.bf16.msra.mxu0 %v4956_v23 }
  0xa9   :  { %1398 = vmatprep.subr.bf16.mxu0 %v4964_v25  ;;  %v5021_v25 = vld [vmem:[#allocation4 + $0x22c] ss:$16 sps:$4 sm:$0xff]  }
  0xaa   :  { %1479 = vmatpush1.bf16.msra.mxu1 %v4959_v44  ;;  %v5042_v44 = vld [vmem:[#allocation4 + $0x2a4] ss:$16 sps:$4 sm:$0xff]  }
  0xab   :  { %1480 = vmatprep.subr.bf16.mxu1 %v4967_v46 }
  0xac   :  { %1399 = vmatpush1.bf16.msra.mxu0 %v4962_v27  ;;  %v5019_v27 = vld [vmem:[#allocation4 + $0x228] ss:$16 sps:$4 sm:$0xff]  }
  0xad   :  { %1400 = vmatprep.subr.bf16.mxu0 %v4970_v29  ;;  %v5027_v29 = vld [vmem:[#allocation4 + $0x24c] ss:$16 sps:$4 sm:$0xff]  }
  0xae   :  { %1481 = vmatpush1.bf16.msra.mxu1 %v4965_v48 }
  0xaf   :  { %1482 = vmatprep.subr.bf16.mxu1 %v4973_v49 }
  0xb0   :  { %1401 = vmatpush1.bf16.msra.mxu0 %v4968_v31  ;;  %v5025_v31 = vld [vmem:[#allocation4 + $0x248] ss:$16 sps:$4 sm:$0xff]  }
  0xb1   :  { %1402 = vmatprep.subr.bf16.mxu0 %v4976_v33  ;;  %v5033_v33 = vld [vmem:[#allocation4 + $0x26c] ss:$16 sps:$4 sm:$0xff]  }
  0xb2   :  { %1483 = vmatpush1.bf16.msra.mxu1 %v4971_v50  ;;  %v5040_v50 = vld [vmem:[#allocation4 + $0x2a0] ss:$16 sps:$4 sm:$0xff]  }
  0xb3   :  { %1484 = vmatprep.subr.bf16.mxu1 %v4979_v51  ;;  %v5043_v51 = vld [vmem:[#allocation4 + $0x2a8] ss:$16 sps:$4 sm:$0xff]  }
  0xb4   :  { %1403 = vmatpush1.bf16.msra.mxu0 %v4974_v35  ;;  %v5028_v35 = vld [vmem:[#allocation4 + $0x260] ss:$16 sps:$4 sm:$0xff]  }
  0xb5   :  { %1404 = vmatprep.subr.bf16.mxu0 %v4982_v37  ;;  %v5036_v37 = vld [vmem:[#allocation4 + $0x284] ss:$16 sps:$4 sm:$0xff]  }
  0xb6   :  { %1485 = vmatpush1.bf16.msra.mxu1 %v4977_v52  ;;  %v5048_v52 = vld [vmem:[#allocation4 + $0x2c4] ss:$16 sps:$4 sm:$0xff]  }
  0xb7   :  { %1486 = vmatprep.subr.bf16.mxu1 %v4985_v53  ;;  %v5051_v53 = vld [vmem:[#allocation4 + $0x2cc] ss:$16 sps:$4 sm:$0xff]  }
  0xb8   :  { %1405 = vmatpush1.bf16.msra.mxu0 %v4980_v39  ;;  %v170_v39 = vrot.slane %v5396_v8, %v5414_v34 }
  0xb9   :  { %1406 = vmatprep.subr.bf16.mxu0 %v4988_v41  ;;  %v5034_v41 = vld [vmem:[#allocation4 + $0x280] ss:$16 sps:$4 sm:$0xff]  }
  0xba   :  { %1487 = vmatpush1.bf16.msra.mxu1 %v4983_v54 }
  0xbb   :  { %1488 = vmatprep.subr.bf16.mxu1 %v4991_v55  ;;  %v5046_v55 = vld [vmem:[#allocation4 + $0x2c0] ss:$16 sps:$4 sm:$0xff]  }
  0xbc   :  { %1407 = vmatpush1.bf16.msra.mxu0 %v4986_v43 }
  0xbd   :  { %1408 = vmatprep.subr.bf16.mxu0 %v4994_v45  ;;  %v5045_v45 = vld [vmem:[#allocation4 + $0x2ac] ss:$16 sps:$4 sm:$0xff]  }
  0xbe   :  { %1489 = vmatpush1.bf16.msra.mxu1 %v4989_v56  ;;  %v5049_v56 = vld [vmem:[#allocation4 + $0x2c8] ss:$16 sps:$4 sm:$0xff]  }
  0xbf   :  { %1490 = vmatprep.subr.bf16.mxu1 %v4997_v57  ;;  %v5054_v57 = vld [vmem:[#allocation4 + $0x2e4] ss:$16 sps:$4 sm:$0xff]  }
  0xc0   :  { %1409 = vmatpush1.bf16.msra.mxu0 %v4992_v47 }
  0xc1   :  { %1410 = vmatprep.subr.bf16.mxu0 %v5000_v59  ;;  %v5052_v59 = vld [vmem:[#allocation4 + $0x2e0] ss:$16 sps:$4 sm:$0xff]  }
  0xc2   :  { %1491 = vmatpush1.bf16.msra.mxu1 %v4995_v58  ;;  %v5057_v58 = vld [vmem:[#allocation4 + $0x2ec] ss:$16 sps:$4 sm:$0xff]  }
  0xc3   :  { %1492 = vmatprep.subr.bf16.mxu1 %v5003_v60  ;;  %v5055_v60 = vld [vmem:[#allocation4 + $0x2e8] ss:$16 sps:$4 sm:$0xff]  }
  0xc4   :  { %1411 = vmatpush1.bf16.msra.mxu0 %v4998_v61  ;;  %v5060_v61 = vld [vmem:[#allocation4 + $0x304] ss:$16 sps:$4 sm:$0xff]  }
  0xc5   :  { %1412 = vmatprep.subr.bf16.mxu0 %v5006_v63  ;;  %v5058_v63 = vld [vmem:[#allocation4 + $0x300] ss:$16 sps:$4 sm:$0xff]  }
  0xc6   :  { %1493 = vmatpush1.bf16.msra.mxu1 %v5001_v62  ;;  %v5063_v62 = vld [vmem:[#allocation4 + $0x30c] ss:$16 sps:$4 sm:$0xff]  }
  0xc7   :  { %1494 = vmatprep.subr.bf16.mxu1 %v5009_v0  ;;  %v5061_v0 = vld [vmem:[#allocation4 + $0x308] ss:$16 sps:$4 sm:$0xff]  }
  0xc8   :  { %1413 = vmatpush1.bf16.msra.mxu0 %v5004_v1  ;;  %v5066_v1 = vld [vmem:[#allocation4 + $0x324] ss:$16 sps:$4 sm:$0xff]  }
  0xc9   :  { %1423 = vmatprep.subr.bf16.mxu0 %v5012_v3  ;;  %v5064_v3 = vld [vmem:[#allocation4 + $0x320] ss:$16 sps:$4 sm:$0xff]  }
  0xca   :  { %1495 = vmatpush1.bf16.msra.mxu1 %v5007_v2  ;;  %v5069_v2 = vld [vmem:[#allocation4 + $0x32c] ss:$16 sps:$4 sm:$0xff]  }
  0xcb   :  { %1505 = vmatprep.subr.bf16.mxu1 %v5015_v4  ;;  %v5067_v4 = vld [vmem:[#allocation4 + $0x328] ss:$16 sps:$4 sm:$0xff]  }
 0x15e   :  { %v536_v12 = vpop.f32.mrb[0].mxu0 }
 0x15f   :  { %v537_v13 = vadd.f32 %v536_v12, %v158_v10  ;;  %v538_v14 = vpop.f32.mrb[1].mxu0  ;;  %v5075_v10 = vld [vmem:[#allocation4 + $0x34c] ss:$16 sps:$4 sm:$0xff]   ;;  %v5073_v12 = vld [vmem:[#allocation4 + $0x348] ss:$16 sps:$4 sm:$0xff]  }
 0x160   :  { %v539_v15 = vadd.f32 %v538_v14, %v162_v11  ;;  %v540_v16 = vpop.f32.mrb[2].mxu0  ;;  %v5418_v40 = vpop.f32.mrb[0].mxu1  ;;  %v5070_v11 = vld [vmem:[#allocation4 + $0x340] ss:$16 sps:$4 sm:$0xff]   ;;  %v5081_v14 = vld [vmem:[#allocation4 + $0x36c] ss:$16 sps:$4 sm:$0xff]  }
 0x161   :  { %v5405_v17 = vmax.f32 %v537_v13, 0.0  ;;  %v541_v18 = vpop.f32.mrb[3].mxu0  ;;  %v579_v43 = vpop.f32.mrb[1].mxu1  ;;  %v5078_v13 = vld [vmem:[#allocation4 + $0x364] ss:$16 sps:$4 sm:$0xff]  }
 0x162   :  { %v5407_v19 = vmax.f32 %v539_v15, 0.0  ;;  %v580_v46 = vadd.f32 %v579_v43, %v170_v39  ;;  %v581_v47 = vpop.f32.mrb[2].mxu1  ;;  %v5076_v15 = vld [vmem:[#allocation4 + $0x360] ss:$16 sps:$4 sm:$0xff]   ;;  %v5079_v16 = vld [vmem:[#allocation4 + $0x368] ss:$16 sps:$4 sm:$0xff]  }
 0x163   :  { %v588_v23 = vpack.c.bf16 %v5405_v17, %v5405_v17  ;;  %v582_v48 = vpop.f32.mrb[3].mxu1  ;;  %v5084_v18 = vld [vmem:[#allocation4 + $0x384] ss:$16 sps:$4 sm:$0xff]   ;;  %v1559_v39 = vld [vmem:[#allocation6 + $0x8] sm:$0xff] }
 0x164   :  { %v589_v20 = vpack.c.bf16 %v5407_v19, %v5407_v19  ;;  %v5420_v49 = vmax.f32 %v580_v46, 0.0  ;;  %v1566_v46 = vld [vmem:[#allocation6 + $0x40] sm:$0xff]  ;;  %v1567_v47 = vld [vmem:[#allocation6 + $0x48] sm:$0xff] }
 0x165   :  { %v1571_v48 = vld [vmem:[#allocation6 + $0x68] sm:$0xff] }
 0x166   :  { %1414 = vmatprep.mubr.bf16.mxu0 %v589_v20  ;;  %1496 = vmatprep.mubr.bf16.mxu1 %v589_v20  ;;  %v591_v54 = vpack.c.bf16 %v5420_v49, %v5420_v49  ;;  %v5087_v20 = vld [vmem:[#allocation4 + $0x38c] ss:$16 sps:$4 sm:$0xff]  }
 0x167   :  { %1415 = vmatmul.mubr.bf16.vlgmr.msra.gmra.mrb[4].mxu0 %v588_v23  ;;  %1497 = vmatmul.mubr.bf16.vlgmr.msra.gmra.mrb[4].mxu1 %v588_v23  ;;  %v5425_v23 = vsub.s32 2, %v5388_v6 }
 0x168   :  { %1424 = vmatpush1.bf16.msra.mxu0 %v5010_v21  ;;  %1506 = vmatpush1.bf16.msra.mxu1 %v5013_v22  ;;  %v5082_v21 = vld [vmem:[#allocation4 + $0x380] ss:$16 sps:$4 sm:$0xff]   ;;  %v5085_v22 = vld [vmem:[#allocation4 + $0x388] ss:$16 sps:$4 sm:$0xff]  }
 0x169   :  { %1425 = vmatprep.subr.bf16.mxu0 %v5018_v24  ;;  %1507 = vmatprep.subr.bf16.mxu1 %v5021_v25  ;;  %v5090_v24 = vld [vmem:[#allocation4 + $0x3a4] ss:$16 sps:$4 sm:$0xff]   ;;  %v5093_v25 = vld [vmem:[#allocation4 + $0x3ac] ss:$16 sps:$4 sm:$0xff]  }
 0x16a   :  { %1455 = vmatprep.mubr.bf16.mxu0 %v591_v54  ;;  %1537 = vmatprep.mubr.bf16.mxu1 %v591_v54  ;;  %v4372_v54 = vcombine.high %v1567_v47, %v1571_v48 }
 0x16c   :  { %1426 = vmatpush1.bf16.msra.mxu0 %v5016_v26  ;;  %1508 = vmatpush1.bf16.msra.mxu1 %v5019_v27  ;;  %v5088_v26 = vld [vmem:[#allocation4 + $0x3a0] ss:$16 sps:$4 sm:$0xff]   ;;  %v5091_v27 = vld [vmem:[#allocation4 + $0x3a8] ss:$16 sps:$4 sm:$0xff]  }
 0x16d   :  { %1427 = vmatprep.subr.bf16.mxu0 %v5024_v28  ;;  %1509 = vmatprep.subr.bf16.mxu1 %v5027_v29  ;;  %v166_v28 = vrot.slane %v5396_v8, %v5425_v23  ;;  %v5096_v29 = vld [vmem:[#allocation4 + $0x3c4] ss:$16 sps:$4 sm:$0xff]   ;;  %v5100_v8 = vld [vmem:[#allocation4 + $0x3e0] ss:$16 sps:$4 sm:$0xff]  }
 0x170   :  { %1428 = vmatpush1.bf16.msra.mxu0 %v5022_v30  ;;  %1510 = vmatpush1.bf16.msra.mxu1 %v5025_v31  ;;  %v5099_v30 = vld [vmem:[#allocation4 + $0x3cc] ss:$16 sps:$4 sm:$0xff]   ;;  %v5094_v31 = vld [vmem:[#allocation4 + $0x3c0] ss:$16 sps:$4 sm:$0xff]  }
 0x171   :  { %1429 = vmatprep.subr.bf16.mxu0 %v5030_v32  ;;  %1511 = vmatprep.subr.bf16.mxu1 %v5033_v33  ;;  %v5097_v32 = vld [vmem:[#allocation4 + $0x3c8] ss:$16 sps:$4 sm:$0xff]   ;;  %v578_v33 = vadd.f32 %v5418_v40, %v166_v28  ;;  %v1570_v40 = vld [vmem:[#allocation6 + $0x60] sm:$0xff] }
 0x173   :  { %v5430_v43 = vmax.f32 %v578_v33, 0.0  ;;  %v1611_v33 = vld [vmem:[#allocation6 + $0x1a8] sm:$0xff] }
 0x174   :  { %1430 = vmatpush1.bf16.msra.mxu0 %v5028_v35  ;;  %1512 = vmatpush1.bf16.msra.mxu1 %v5031_v36  ;;  %v5102_v35 = vld [vmem:[#allocation4 + $0x3e4] ss:$16 sps:$4 sm:$0xff]   ;;  %v5105_v36 = vld [vmem:[#allocation4 + $0x3ec] ss:$16 sps:$4 sm:$0xff]  }
 0x175   :  { %1431 = vmatprep.subr.bf16.mxu0 %v5036_v37  ;;  %1513 = vmatprep.subr.bf16.mxu1 %v5039_v38  ;;  %v1558_v37 = vld [vmem:[#allocation6] sm:$0xff] }
 0x176   :  { %v1562_v38 = vld [vmem:[#allocation6 + $0x20] sm:$0xff] }
 0x178   :  { %1432 = vmatpush1.bf16.msra.mxu0 %v5034_v41  ;;  %1514 = vmatpush1.bf16.msra.mxu1 %v5037_v42  ;;  %v1563_v41 = vld [vmem:[#allocation6 + $0x28] sm:$0xff] }
 0x179   :  { %1433 = vmatprep.subr.bf16.mxu0 %v5042_v44  ;;  %1515 = vmatprep.subr.bf16.mxu1 %v5045_v45  ;;  %v5103_v42 = vld [vmem:[#allocation4 + $0x3e8] ss:$16 sps:$4 sm:$0xff]   ;;  %v4362_v44 = vcombine.high %v1558_v37, %v1562_v38  ;;  %v4364_v45 = vcombine.high %v1559_v39, %v1563_v41 }
 0x17c   :  { %1434 = vmatpush1.bf16.msra.mxu0 %v5040_v50  ;;  %1516 = vmatpush1.bf16.msra.mxu1 %v5043_v51  ;;  %v4361_v50 = vcombine.low %v1558_v37, %v1562_v38  ;;  %v4363_v51 = vcombine.low %v1559_v39, %v1563_v41  ;;  %v1614_v39 = vld [vmem:[#allocation6 + $0x1c0] sm:$0xff] }
 0x17d   :  { %1435 = vmatprep.subr.bf16.mxu0 %v5048_v52  ;;  %1517 = vmatprep.subr.bf16.mxu1 %v5051_v53  ;;  %v590_v52 = vpack.c.bf16 %v5430_v43, %v5430_v43  ;;  %v4370_v53 = vcombine.high %v1566_v46, %v1570_v40  ;;  %v1618_v41 = vld [vmem:[#allocation6 + $0x1e0] sm:$0xff] }
 0x180   :  { %1436 = vmatpush1.bf16.msra.mxu0 %v5046_v55  ;;  %1518 = vmatpush1.bf16.msra.mxu1 %v5049_v56  ;;  %v1574_v55 = vld [vmem:[#allocation6 + $0x80] sm:$0xff] }
 0x181   :  { %1437 = vmatprep.subr.bf16.mxu0 %v5054_v57  ;;  %1519 = vmatprep.subr.bf16.mxu1 %v5057_v58  ;;  %v1578_v56 = vld [vmem:[#allocation6 + $0xa0] sm:$0xff]  ;;  %v1575_v57 = vld [vmem:[#allocation6 + $0x88] sm:$0xff] }
 0x182   :  { %v1579_v58 = vld [vmem:[#allocation6 + $0xa8] sm:$0xff] }
 0x184   :  { %1438 = vmatpush1.bf16.msra.mxu0 %v5052_v59  ;;  %1520 = vmatpush1.bf16.msra.mxu1 %v5055_v60  ;;  %v4369_v59 = vcombine.low %v1566_v46, %v1570_v40  ;;  %v4371_v60 = vcombine.low %v1567_v47, %v1571_v48  ;;  %v4418_v46 = vcombine.high %v1614_v39, %v1618_v41  ;;  %v1622_v47 = vld [vmem:[#allocation6 + $0x200] sm:$0xff] }
 0x185   :  { %1439 = vmatprep.subr.bf16.mxu0 %v5060_v61  ;;  %1521 = vmatprep.subr.bf16.mxu1 %v5063_v62  ;;  %v4378_v61 = vcombine.high %v1574_v55, %v1578_v56  ;;  %v4380_v62 = vcombine.high %v1575_v57, %v1579_v58  ;;  %v1626_v48 = vld [vmem:[#allocation6 + $0x220] sm:$0xff] }
 0x188   :  { %1440 = vmatpush1.bf16.msra.mxu0 %v5058_v63  ;;  %1522 = vmatpush1.bf16.msra.mxu1 %v5061_v0  ;;  %v1582_v63 = vld [vmem:[#allocation6 + $0xc0] sm:$0xff] }
 0x189   :  { %1441 = vmatprep.subr.bf16.mxu0 %v5066_v1  ;;  %1523 = vmatprep.subr.bf16.mxu1 %v5069_v2  ;;  %v1586_v0 = vld [vmem:[#allocation6 + $0xe0] sm:$0xff]  ;;  %v1583_v1 = vld [vmem:[#allocation6 + $0xc8] sm:$0xff] }
 0x18a   :  { %v1587_v2 = vld [vmem:[#allocation6 + $0xe8] sm:$0xff] }
 0x18c   :  { %1442 = vmatpush1.bf16.msra.mxu0 %v5064_v3  ;;  %1524 = vmatpush1.bf16.msra.mxu1 %v5067_v4  ;;  %v4377_v3 = vcombine.low %v1574_v55, %v1578_v56  ;;  %v4379_v4 = vcombine.low %v1575_v57, %v1579_v58  ;;  %v1630_v56 = vld [vmem:[#allocation6 + $0x240] sm:$0xff]  ;;  %v1631_v58 = vld [vmem:[#allocation6 + $0x248] sm:$0xff] }
 0x18d   :  { %1443 = vmatprep.subr.bf16.mxu0 %v5072_v5  ;;  %1525 = vmatprep.subr.bf16.mxu1 %v5075_v10  ;;  %v4386_v5 = vcombine.high %v1582_v63, %v1586_v0  ;;  %v4388_v10 = vcombine.high %v1583_v1, %v1587_v2  ;;  %v1634_v57 = vld [vmem:[#allocation6 + $0x260] sm:$0xff] }
 0x190   :  { %1444 = vmatpush1.bf16.msra.mxu0 %v5070_v11  ;;  %1526 = vmatpush1.bf16.msra.mxu1 %v5073_v12  ;;  %v1590_v11 = vld [vmem:[#allocation6 + $0x100] sm:$0xff] }
 0x191   :  { %1445 = vmatprep.subr.bf16.mxu0 %v5078_v13  ;;  %1527 = vmatprep.subr.bf16.mxu1 %v5081_v14  ;;  %v1594_v12 = vld [vmem:[#allocation6 + $0x120] sm:$0xff]  ;;  %v1591_v13 = vld [vmem:[#allocation6 + $0x108] sm:$0xff] }
 0x192   :  { %v1595_v14 = vld [vmem:[#allocation6 + $0x128] sm:$0xff] }
 0x194   :  { %1446 = vmatpush1.bf16.msra.mxu0 %v5076_v15  ;;  %1528 = vmatpush1.bf16.msra.mxu1 %v5079_v16  ;;  %v4385_v15 = vcombine.low %v1582_v63, %v1586_v0  ;;  %v4387_v16 = vcombine.low %v1583_v1, %v1587_v2  ;;  %v1638_v0 = vld [vmem:[#allocation6 + $0x280] sm:$0xff]  ;;  %v1639_v2 = vld [vmem:[#allocation6 + $0x288] sm:$0xff] }
 0x195   :  { %1447 = vmatprep.subr.bf16.mxu0 %v5084_v18  ;;  %1529 = vmatprep.subr.bf16.mxu1 %v5087_v20  ;;  %v4394_v18 = vcombine.high %v1590_v11, %v1594_v12  ;;  %v4396_v20 = vcombine.high %v1591_v13, %v1595_v14  ;;  %v1642_v1 = vld [vmem:[#allocation6 + $0x2a0] sm:$0xff] }
 0x198   :  { %1448 = vmatpush1.bf16.msra.mxu0 %v5082_v21  ;;  %1530 = vmatpush1.bf16.msra.mxu1 %v5085_v22  ;;  %v1598_v21 = vld [vmem:[#allocation6 + $0x140] sm:$0xff] }
 0x199   :  { %1449 = vmatprep.subr.bf16.mxu0 %v5090_v24  ;;  %1531 = vmatprep.subr.bf16.mxu1 %v5093_v25  ;;  %v1602_v22 = vld [vmem:[#allocation6 + $0x160] sm:$0xff]  ;;  %v1599_v24 = vld [vmem:[#allocation6 + $0x148] sm:$0xff] }
 0x19a   :  { %v1603_v25 = vld [vmem:[#allocation6 + $0x168] sm:$0xff]  ;;  %v4402_v28 = vcombine.high %v1598_v21, %v1602_v22 }
 0x19c   :  { %1450 = vmatpush1.bf16.msra.mxu0 %v5088_v26  ;;  %1532 = vmatpush1.bf16.msra.mxu1 %v5091_v27  ;;  %v4393_v26 = vcombine.low %v1590_v11, %v1594_v12  ;;  %v4395_v27 = vcombine.low %v1591_v13, %v1595_v14  ;;  %v1646_v12 = vld [vmem:[#allocation6 + $0x2c0] sm:$0xff]  ;;  %v1647_v14 = vld [vmem:[#allocation6 + $0x2c8] sm:$0xff] }
 0x19d   :  { %1451 = vmatprep.subr.bf16.mxu0 %v5096_v29  ;;  %1533 = vmatprep.subr.bf16.mxu1 %v5099_v30  ;;  %v4404_v29 = vcombine.high %v1599_v24, %v1603_v25  ;;  %v1606_v30 = vld [vmem:[#allocation6 + $0x180] sm:$0xff] }
 0x19e   :  { %v1650_v13 = vld [vmem:[#allocation6 + $0x2e0] sm:$0xff] }
 0x1a0   :  { %1452 = vmatpush1.bf16.msra.mxu0 %v5094_v31  ;;  %1534 = vmatpush1.bf16.msra.mxu1 %v5097_v32  ;;  %v1610_v31 = vld [vmem:[#allocation6 + $0x1a0] sm:$0xff]  ;;  %v1607_v32 = vld [vmem:[#allocation6 + $0x188] sm:$0xff] }
 0x1a1   :  { %1453 = vmatprep.subr.bf16.mxu0 %v5102_v35  ;;  %1535 = vmatprep.subr.bf16.mxu1 %v5105_v36  ;;  %v4401_v35 = vcombine.low %v1598_v21, %v1602_v22  ;;  %v4403_v36 = vcombine.low %v1599_v24, %v1603_v25  ;;  %v4410_v37 = vcombine.high %v1606_v30, %v1610_v31  ;;  %v1654_v22 = vld [vmem:[#allocation6 + $0x300] sm:$0xff]  ;;  %v1655_v25 = vld [vmem:[#allocation6 + $0x308] sm:$0xff] }
 0x1a2   :  { %v4412_v38 = vcombine.high %v1607_v32, %v1611_v33  ;;  %v1658_v24 = vld [vmem:[#allocation6 + $0x320] sm:$0xff] }
 0x1a4   :  { %1454 = vmatpush1.bf16.msra.mxu0 %v5100_v8  ;;  %1536 = vmatpush1.bf16.msra.mxu1 %v5103_v42  ;;  %v1615_v8 = vld [vmem:[#allocation6 + $0x1c8] sm:$0xff] }
 0x1a5   :  { %3136 = vmatprep.subr.bf16.mxu0 %v4362_v44  ;;  %3218 = vmatprep.subr.bf16.mxu1 %v4364_v45  ;;  %v1619_v42 = vld [vmem:[#allocation6 + $0x1e8] sm:$0xff]  ;;  %v4409_v44 = vcombine.low %v1606_v30, %v1610_v31  ;;  %v4411_v45 = vcombine.low %v1607_v32, %v1611_v33  ;;  %v1662_v31 = vld [vmem:[#allocation6 + $0x340] sm:$0xff] }
 0x1a6   :  { %v4420_v40 = vcombine.high %v1615_v8, %v1619_v42  ;;  %v1666_v32 = vld [vmem:[#allocation6 + $0x360] sm:$0xff]  ;;  %v1663_v33 = vld [vmem:[#allocation6 + $0x348] sm:$0xff] }
 0x1a7   :  { %1456 = vmatmul.mubr.bf16.vlgmr.msra.gmra.mrb[4].mxu0 %v590_v52  ;;  %1538 = vmatmul.mubr.bf16.vlgmr.msra.gmra.mrb[4].mxu1 %v590_v52  ;;  %v4417_v52 = vcombine.low %v1614_v39, %v1618_v41  ;;  %v4465_v41 = vcombine.low %v1662_v31, %v1666_v32 }
 0x1a8   :  { %3137 = vmatpush1.bf16.msra.mxu0 %v4361_v50  ;;  %3219 = vmatpush1.bf16.msra.mxu1 %v4363_v51  ;;  %v1623_v50 = vld [vmem:[#allocation6 + $0x208] sm:$0xff] }
 0x1a9   :  { %3138 = vmatprep.subr.bf16.mxu0 %v4370_v53  ;;  %3220 = vmatprep.subr.bf16.mxu1 %v4372_v54  ;;  %v1627_v51 = vld [vmem:[#allocation6 + $0x228] sm:$0xff]  ;;  %v4419_v53 = vcombine.low %v1615_v8, %v1619_v42  ;;  %v4426_v54 = vcombine.high %v1622_v47, %v1626_v48  ;;  %v1670_v42 = vld [vmem:[#allocation6 + $0x380] sm:$0xff] }
 0x1aa   :  { %v4428_v55 = vcombine.high %v1623_v50, %v1627_v51 }
 0x1ac   :  { %3139 = vmatpush1.bf16.msra.mxu0 %v4369_v59  ;;  %3221 = vmatpush1.bf16.msra.mxu1 %v4371_v60  ;;  %v1635_v59 = vld [vmem:[#allocation6 + $0x268] sm:$0xff]  ;;  %v4425_v60 = vcombine.low %v1622_v47, %v1626_v48 }
 0x1ad   :  { %3140 = vmatprep.subr.bf16.mxu0 %v4378_v61  ;;  %3222 = vmatprep.subr.bf16.mxu1 %v4380_v62  ;;  %v4427_v61 = vcombine.low %v1623_v50, %v1627_v51  ;;  %v4434_v62 = vcombine.high %v1630_v56, %v1634_v57  ;;  %v4436_v63 = vcombine.high %v1631_v58, %v1635_v59  ;;  %v1678_v51 = vld [vmem:[#allocation6 + $0x3c0] sm:$0xff] }
 0x1b0   :  { %3141 = vmatpush1.bf16.msra.mxu0 %v4377_v3  ;;  %3223 = vmatpush1.bf16.msra.mxu1 %v4379_v4  ;;  %v1643_v3 = vld [vmem:[#allocation6 + $0x2a8] sm:$0xff]  ;;  %v4433_v4 = vcombine.low %v1630_v56, %v1634_v57 }
 0x1b1   :  { %3142 = vmatprep.subr.bf16.mxu0 %v4386_v5  ;;  %3224 = vmatprep.subr.bf16.mxu1 %v4388_v10  ;;  %v4435_v5 = vcombine.low %v1631_v58, %v1635_v59  ;;  %v4442_v10 = vcombine.high %v1638_v0, %v1642_v1  ;;  %v4444_v11 = vcombine.high %v1639_v2, %v1643_v3  ;;  %v1686_v59 = vld [vmem:[#allocation6 + $0x400] sm:$0xff] }
 0x1b4   :  { %3143 = vmatpush1.bf16.msra.mxu0 %v4385_v15  ;;  %3225 = vmatpush1.bf16.msra.mxu1 %v4387_v16  ;;  %v1651_v15 = vld [vmem:[#allocation6 + $0x2e8] sm:$0xff]  ;;  %v4441_v16 = vcombine.low %v1638_v0, %v1642_v1 }
 0x1b5   :  { %3144 = vmatprep.subr.bf16.mxu0 %v4394_v18  ;;  %3226 = vmatprep.subr.bf16.mxu1 %v4396_v20  ;;  %v4443_v18 = vcombine.low %v1639_v2, %v1643_v3  ;;  %v4450_v20 = vcombine.high %v1646_v12, %v1650_v13  ;;  %v4452_v21 = vcombine.high %v1647_v14, %v1651_v15  ;;  %v5437_v3 = vld [vmem:[%s5509_s4] sm:$0xf] }
 0x1b8   :  { %3145 = vmatpush1.bf16.msra.mxu0 %v4393_v26  ;;  %3227 = vmatpush1.bf16.msra.mxu1 %v4395_v27  ;;  %v1659_v26 = vld [vmem:[#allocation6 + $0x328] sm:$0xff]  ;;  %v4449_v27 = vcombine.low %v1646_v12, %v1650_v13 }
 0x1b9   :  { %3146 = vmatprep.subr.bf16.mxu0 %v4402_v28  ;;  %3228 = vmatprep.subr.bf16.mxu1 %v4404_v29  ;;  %v4451_v28 = vcombine.low %v1647_v14, %v1651_v15  ;;  %v4458_v29 = vcombine.high %v1654_v22, %v1658_v24  ;;  %v4460_v30 = vcombine.high %v1655_v25, %v1659_v26 }
 0x1bc   :  { %3147 = vmatpush1.bf16.msra.mxu0 %v4401_v35  ;;  %3229 = vmatpush1.bf16.msra.mxu1 %v4403_v36  ;;  %v1667_v35 = vld [vmem:[#allocation6 + $0x368] sm:$0xff]  ;;  %v4457_v36 = vcombine.low %v1654_v22, %v1658_v24 }
 0x1bd   :  { %3148 = vmatprep.subr.bf16.mxu0 %v4410_v37  ;;  %3230 = vmatprep.subr.bf16.mxu1 %v4412_v38  ;;  %v4459_v37 = vcombine.low %v1655_v25, %v1659_v26  ;;  %v4466_v38 = vcombine.high %v1662_v31, %v1666_v32  ;;  %v4468_v39 = vcombine.high %v1663_v33, %v1667_v35  ;;  %v1698_v32 = vld [vmem:[#allocation6 + $0x460] sm:$0xff] }
 0x1be   :  { %v4467_v8 = vcombine.low %v1663_v33, %v1667_v35  ;;  %v1695_v33 = vld [vmem:[#allocation6 + $0x448] sm:$0xff] }
 0x1bf   :  { %v1699_v35 = vld [vmem:[#allocation6 + $0x468] sm:$0xff] }
 0x1c0   :  { %3149 = vmatpush1.bf16.msra.mxu0 %v4409_v44  ;;  %3231 = vmatpush1.bf16.msra.mxu1 %v4411_v45  ;;  %v1674_v44 = vld [vmem:[#allocation6 + $0x3a0] sm:$0xff]  ;;  %v1671_v45 = vld [vmem:[#allocation6 + $0x388] sm:$0xff] }
 0x1c1   :  { %3150 = vmatprep.subr.bf16.mxu0 %v4418_v46  ;;  %3232 = vmatprep.subr.bf16.mxu1 %v4420_v40  ;;  %v4474_v46 = vcombine.high %v1670_v42, %v1674_v44  ;;  %v1675_v40 = vld [vmem:[#allocation6 + $0x3a8] sm:$0xff]  ;;  %v4473_v47 = vcombine.low %v1670_v42, %v1674_v44  ;;  %v4499_v44 = vcombine.low %v1695_v33, %v1699_v35 }
 0x1c2   :  { %v4475_v48 = vcombine.low %v1671_v45, %v1675_v40  ;;  %v4476_v50 = vcombine.high %v1671_v45, %v1675_v40  ;;  %v1710_v40 = vld [vmem:[#allocation6 + $0x4c0] sm:$0xff] }
 0x1c4   :  { %3151 = vmatpush1.bf16.msra.mxu0 %v4417_v52  ;;  %3233 = vmatpush1.bf16.msra.mxu1 %v4419_v53  ;;  %v1682_v52 = vld [vmem:[#allocation6 + $0x3e0] sm:$0xff]  ;;  %v1679_v53 = vld [vmem:[#allocation6 + $0x3c8] sm:$0xff] }
 0x1c5   :  { %3152 = vmatprep.subr.bf16.mxu0 %v4426_v54  ;;  %3234 = vmatprep.subr.bf16.mxu1 %v4428_v55  ;;  %v4482_v54 = vcombine.high %v1678_v51, %v1682_v52  ;;  %v1683_v55 = vld [vmem:[#allocation6 + $0x3e8] sm:$0xff]  ;;  %v4481_v56 = vcombine.low %v1678_v51, %v1682_v52 }
 0x1c6   :  { %v4483_v57 = vcombine.low %v1679_v53, %v1683_v55  ;;  %v4484_v58 = vcombine.high %v1679_v53, %v1683_v55  ;;  %v1718_v55 = vld [vmem:[#allocation6 + $0x500] sm:$0xff] }
 0x1c8   :  { %3153 = vmatpush1.bf16.msra.mxu0 %v4425_v60  ;;  %3235 = vmatpush1.bf16.msra.mxu1 %v4427_v61  ;;  %v1690_v60 = vld [vmem:[#allocation6 + $0x420] sm:$0xff]  ;;  %v1687_v61 = vld [vmem:[#allocation6 + $0x408] sm:$0xff] }
 0x1c9   :  { %3154 = vmatprep.subr.bf16.mxu0 %v4434_v62  ;;  %3236 = vmatprep.subr.bf16.mxu1 %v4436_v63  ;;  %v4490_v62 = vcombine.high %v1686_v59, %v1690_v60  ;;  %v1691_v63 = vld [vmem:[#allocation6 + $0x428] sm:$0xff]  ;;  %v4489_v0 = vcombine.low %v1686_v59, %v1690_v60 }
 0x1ca   :  { %v4491_v1 = vcombine.low %v1687_v61, %v1691_v63  ;;  %v4492_v2 = vcombine.high %v1687_v61, %v1691_v63  ;;  %v1726_v63 = vld [vmem:[#allocation6 + $0x540] sm:$0xff] }
 0x1cc   :  { %3155 = vmatpush1.bf16.msra.mxu0 %v4433_v4  ;;  %3237 = vmatpush1.bf16.msra.mxu1 %v4435_v5  ;;  %v725_v4 = vrot.slane %v5437_v3, %v5391_v7  ;;  %v729_v5 = vrot.slane %v5437_v3, %v5399_v9 }
 0x1cd   :  { %3156 = vmatprep.subr.bf16.mxu0 %v4442_v10  ;;  %3238 = vmatprep.subr.bf16.mxu1 %v4444_v11  ;;  %v737_v10 = vrot.slane %v5437_v3, %v5414_v34 }
 0x1d0   :  { %3157 = vmatpush1.bf16.msra.mxu0 %v4441_v16  ;;  %3239 = vmatpush1.bf16.msra.mxu1 %v4443_v18 }
 0x1d1   :  { %3158 = vmatprep.subr.bf16.mxu0 %v4450_v20  ;;  %3240 = vmatprep.subr.bf16.mxu1 %v4452_v21 }
 0x1d4   :  { %3159 = vmatpush1.bf16.msra.mxu0 %v4449_v27  ;;  %3241 = vmatpush1.bf16.msra.mxu1 %v4451_v28 }
 0x1d5   :  { %3160 = vmatprep.subr.bf16.mxu0 %v4458_v29  ;;  %3242 = vmatprep.subr.bf16.mxu1 %v4460_v30  ;;  %v1694_v30 = vld [vmem:[#allocation6 + $0x440] sm:$0xff] }
 0x1d8   :  { %3161 = vmatpush1.bf16.msra.mxu0 %v4457_v36  ;;  %3243 = vmatpush1.bf16.msra.mxu1 %v4459_v37 }
 0x1d9   :  { %3162 = vmatprep.subr.bf16.mxu0 %v4466_v38  ;;  %3244 = vmatprep.subr.bf16.mxu1 %v4468_v39  ;;  %v1702_v38 = vld [vmem:[#allocation6 + $0x480] sm:$0xff]  ;;  %v4498_v39 = vcombine.high %v1694_v30, %v1698_v32 }
 0x1dc   :  { %3163 = vmatpush1.bf16.msra.mxu0 %v4465_v41  ;;  %3245 = vmatpush1.bf16.msra.mxu1 %v4467_v8  ;;  %v4500_v41 = vcombine.high %v1695_v33, %v1699_v35  ;;  %v1703_v8 = vld [vmem:[#allocation6 + $0x488] sm:$0xff]  ;;  %v1754_v33 = vld [vmem:[#allocation6 + $0x620] sm:$0xff] }
 0x1dd   :  { %3164 = vmatprep.subr.bf16.mxu0 %v4474_v46  ;;  %3246 = vmatprep.subr.bf16.mxu1 %v4476_v50  ;;  %v1715_v50 = vld [vmem:[#allocation6 + $0x4e8] sm:$0xff] }
 0x1de   :  { %v1751_v35 = vld [vmem:[#allocation6 + $0x608] sm:$0xff] }
 0x1e0   :  { %3165 = vmatpush1.bf16.msra.mxu0 %v4473_v47  ;;  %3247 = vmatpush1.bf16.msra.mxu1 %v4475_v48  ;;  %v1714_v47 = vld [vmem:[#allocation6 + $0x4e0] sm:$0xff]  ;;  %v1711_v48 = vld [vmem:[#allocation6 + $0x4c8] sm:$0xff] }
 0x1e1   :  { %3166 = vmatprep.subr.bf16.mxu0 %v4482_v54  ;;  %3248 = vmatprep.subr.bf16.mxu1 %v4484_v58  ;;  %v4514_v53 = vcombine.high %v1710_v40, %v1714_v47  ;;  %v4516_v54 = vcombine.high %v1711_v48, %v1715_v50  ;;  %v1723_v58 = vld [vmem:[#allocation6 + $0x528] sm:$0xff]  ;;  %v4513_v59 = vcombine.low %v1710_v40, %v1714_v47 }
 0x1e2   :  { %v4515_v60 = vcombine.low %v1711_v48, %v1715_v50  ;;  %v1766_v50 = vld [vmem:[#allocation6 + $0x680] sm:$0xff] }
 0x1e4   :  { %3167 = vmatpush1.bf16.msra.mxu0 %v4481_v56  ;;  %3249 = vmatpush1.bf16.msra.mxu1 %v4483_v57  ;;  %v1722_v56 = vld [vmem:[#allocation6 + $0x520] sm:$0xff]  ;;  %v1719_v57 = vld [vmem:[#allocation6 + $0x508] sm:$0xff] }
 0x1e5   :  { %3177 = vmatprep.subr.bf16.mxu0 %v4490_v62  ;;  %3259 = vmatprep.subr.bf16.mxu1 %v4492_v2  ;;  %v4522_v61 = vcombine.high %v1718_v55, %v1722_v56  ;;  %v4524_v62 = vcombine.high %v1719_v57, %v1723_v58  ;;  %v1731_v2 = vld [vmem:[#allocation6 + $0x568] sm:$0xff] }
 0x27a   :  { %v1457_v11 = vpop.f32.mrb[4].mxu0  ;;  %v5445_v12 = vpop.f32.mrb[4].mxu1 }
 0x27b   :  { %v4770_v13 = vadd.f32 %v1457_v11, %v725_v4  ;;  %v1459_v14 = vpop.f32.mrb[5].mxu0  ;;  %v1541_v15 = vpop.f32.mrb[5].mxu1  ;;  %v4521_v4 = vcombine.low %v1718_v55, %v1722_v56 }
 0x27c   :  { %v4771_v16 = vadd.f32 %v1459_v14, %v729_v5  ;;  %v4773_v18 = vadd.f32 %v1541_v15, %v737_v10  ;;  %v1461_v20 = vpop.f32.mrb[6].mxu0  ;;  %v1543_v21 = vpop.f32.mrb[6].mxu1  ;;  %v4523_v5 = vcombine.low %v1719_v57, %v1723_v58  ;;  %v1738_v14 = vld [vmem:[#allocation6 + $0x5a0] sm:$0xff]  ;;  %v1735_v15 = vld [vmem:[#allocation6 + $0x588] sm:$0xff] }
 0x27d   :  { %v1546_v22 = vmax.f32 %v4770_v13, 0.0  ;;  %v1462_v24 = vpop.f32.mrb[7].mxu0  ;;  %v1544_v25 = vpop.f32.mrb[7].mxu1  ;;  %v1734_v13 = vld [vmem:[#allocation6 + $0x580] sm:$0xff] }
 0x27e   :  { %v1547_v26 = vmax.f32 %v4771_v16, 0.0  ;;  %v1549_v27 = vmax.f32 %v4773_v18, 0.0  ;;  %v1739_v16 = vld [vmem:[#allocation6 + $0x5a8] sm:$0xff]  ;;  %v4538_v21 = vcombine.high %v1734_v13, %v1738_v14  ;;  %v1742_v24 = vld [vmem:[#allocation6 + $0x5c0] sm:$0xff] }
 0x27f   :  { %v1550_v28 = vadd.f32 %v1546_v22, %v5405_v17  ;;  %v1706_v17 = vld [vmem:[#allocation6 + $0x4a0] sm:$0xff]  ;;  %v4540_v22 = vcombine.high %v1735_v15, %v1739_v16 }
 0x280   :  { %v1551_v29 = vadd.f32 %v1547_v26, %v5407_v19  ;;  %v1553_v31 = vadd.f32 %v1549_v27, %v5420_v49  ;;  %v1707_v19 = vld [vmem:[#allocation6 + $0x4a8] sm:$0xff]  ;;  %v4497_v49 = vcombine.low %v1694_v30, %v1698_v32  ;;  %v4506_v45 = vcombine.high %v1702_v38, %v1706_v17  ;;  %v1746_v25 = vld [vmem:[#allocation6 + $0x5e0] sm:$0xff] }
 0x281   :  { %v5452_v37 = vpack.c.bf16 %v1550_v28, %v1550_v28  ;;  %v4508_v46 = vcombine.high %v1703_v8, %v1707_v19  ;;  %v4505_v51 = vcombine.low %v1702_v38, %v1706_v17  ;;  %v4507_v52 = vcombine.low %v1703_v8, %v1707_v19  ;;  %v1743_v26 = vld [vmem:[#allocation6 + $0x5c8] sm:$0xff]  ;;  %v1750_v32 = vld [vmem:[#allocation6 + $0x600] sm:$0xff] }
 0x282   :  { %v5450_v36 = vpack.c.bf16 %v1551_v29, %v1551_v29  ;;  %v5456_v42 = vpack.c.bf16 %v1553_v31, %v1553_v31  ;;  %v1747_v27 = vld [vmem:[#allocation6 + $0x5e8] sm:$0xff]  ;;  %v4537_v28 = vcombine.low %v1734_v13, %v1738_v14  ;;  %v4539_v29 = vcombine.low %v1735_v15, %v1739_v16  ;;  %v1758_v19 = vld [vmem:[#allocation6 + $0x640] sm:$0xff] }
 0x283   :  { %v4546_v30 = vcombine.high %v1742_v24, %v1746_v25  ;;  %v4548_v31 = vcombine.high %v1743_v26, %v1747_v27  ;;  %v1755_v38 = vld [vmem:[#allocation6 + $0x628] sm:$0xff]  ;;  %v4554_v17 = vcombine.high %v1750_v32, %v1754_v33  ;;  %v1774_v58 = vld [vmem:[#allocation6 + $0x6c0] sm:$0xff] }
 0x284   :  { %3168 = vmatprep.mubr.bf16.mxu0 %v5450_v36  ;;  %3250 = vmatprep.mubr.bf16.mxu1 %v5450_v36  ;;  %v4556_v8 = vcombine.high %v1751_v35, %v1755_v38  ;;  %v4555_v40 = vcombine.low %v1751_v35, %v1755_v38  ;;  %v1790_v16 = vld [vmem:[#allocation6 + $0x740] sm:$0xff] }
 0x285   :  { %3169 = vmatmul.mubr.bf16.vlgmr.msra.gmra.mrb[8].mxu0 %v5452_v37  ;;  %3251 = vmatmul.mubr.bf16.vlgmr.msra.gmra.mrb[8].mxu1 %v5452_v37 }
 0x286   :  { %3178 = vmatpush1.bf16.msra.mxu0 %v4489_v0  ;;  %3260 = vmatpush1.bf16.msra.mxu1 %v4491_v1  ;;  %v1730_v0 = vld [vmem:[#allocation6 + $0x560] sm:$0xff]  ;;  %v1727_v1 = vld [vmem:[#allocation6 + $0x548] sm:$0xff] }
 0x287   :  { %3209 = vmatprep.mubr.bf16.mxu0 %v5456_v42  ;;  %3291 = vmatprep.mubr.bf16.mxu1 %v5456_v42  ;;  %v4530_v10 = vcombine.high %v1726_v63, %v1730_v0  ;;  %v4532_v11 = vcombine.high %v1727_v1, %v1731_v2  ;;  %v4529_v18 = vcombine.low %v1726_v63, %v1730_v0 }
 0x288   :  { %3179 = vmatprep.subr.bf16.mxu0 %v4498_v39  ;;  %3261 = vmatprep.subr.bf16.mxu1 %v4500_v41  ;;  %v4531_v20 = vcombine.low %v1727_v1, %v1731_v2  ;;  %v4545_v39 = vcombine.low %v1742_v24, %v1746_v25  ;;  %v4547_v41 = vcombine.low %v1743_v26, %v1747_v27  ;;  %v1782_v2 = vld [vmem:[#allocation6 + $0x700] sm:$0xff] }
 0x289   :  { %v733_v25 = vrot.slane %v5437_v3, %v5425_v23  ;;  %v1810_v3 = vld [vmem:[#allocation6 + $0x7e0] sm:$0xff] }
 0x28a   :  { %3180 = vmatpush1.bf16.msra.mxu0 %v4497_v49  ;;  %3262 = vmatpush1.bf16.msra.mxu1 %v4499_v44  ;;  %v1762_v49 = vld [vmem:[#allocation6 + $0x660] sm:$0xff]  ;;  %v1759_v44 = vld [vmem:[#allocation6 + $0x648] sm:$0xff] }
 0x28b   :  { %3181 = vmatprep.subr.bf16.mxu0 %v4506_v45  ;;  %3263 = vmatprep.subr.bf16.mxu1 %v4508_v46  ;;  %v1763_v45 = vld [vmem:[#allocation6 + $0x668] sm:$0xff]  ;;  %v4553_v46 = vcombine.low %v1750_v32, %v1754_v33  ;;  %v4562_v47 = vcombine.high %v1758_v19, %v1762_v49  ;;  %v4772_v35 = vadd.f32 %v5445_v12, %v733_v25  ;;  %v1561_v12 = vld [vmem:[#allocation6 + $0x18] sm:$0xff]  ;;  %v1596_v25 = vld [vmem:[#allocation6 + $0x130] sm:$0xff] }
 0x28c   :  { %v4564_v48 = vcombine.high %v1759_v44, %v1763_v45  ;;  %v4563_v55 = vcombine.low %v1759_v44, %v1763_v45 }
 0x28d   :  { %v1548_v44 = vmax.f32 %v4772_v35, 0.0  ;;  %v1605_v35 = vld [vmem:[#allocation6 + $0x178] sm:$0xff] }
 0x28e   :  { %3182 = vmatpush1.bf16.msra.mxu0 %v4505_v51  ;;  %3264 = vmatpush1.bf16.msra.mxu1 %v4507_v52  ;;  %v1770_v51 = vld [vmem:[#allocation6 + $0x6a0] sm:$0xff]  ;;  %v1767_v52 = vld [vmem:[#allocation6 + $0x688] sm:$0xff] }
 0x28f   :  { %3183 = vmatprep.subr.bf16.mxu0 %v4514_v53  ;;  %3265 = vmatprep.subr.bf16.mxu1 %v4516_v54  ;;  %v1771_v53 = vld [vmem:[#allocation6 + $0x6a8] sm:$0xff]  ;;  %v4561_v54 = vcombine.low %v1758_v19, %v1762_v49  ;;  %v4570_v56 = vcombine.high %v1766_v50, %v1770_v51 }
 0x290   :  { %v4572_v57 = vcombine.high %v1767_v52, %v1771_v53  ;;  %v4571_v63 = vcombine.low %v1767_v52, %v1771_v53  ;;  %v1552_v52 = vadd.f32 %v1548_v44, %v5430_v43  ;;  %v1580_v43 = vld [vmem:[#allocation6 + $0xb0] sm:$0xff] }
 0x292   :  { %3184 = vmatpush1.bf16.msra.mxu0 %v4513_v59  ;;  %3266 = vmatpush1.bf16.msra.mxu1 %v4515_v60  ;;  %v1778_v59 = vld [vmem:[#allocation6 + $0x6e0] sm:$0xff]  ;;  %v1775_v60 = vld [vmem:[#allocation6 + $0x6c8] sm:$0xff] }
 0x293   :  { %3185 = vmatprep.subr.bf16.mxu0 %v4522_v61  ;;  %3267 = vmatprep.subr.bf16.mxu1 %v4524_v62  ;;  %v1779_v61 = vld [vmem:[#allocation6 + $0x6e8] sm:$0xff]  ;;  %v4569_v62 = vcombine.low %v1766_v50, %v1770_v51  ;;  %v4578_v0 = vcombine.high %v1774_v58, %v1778_v59 }
 0x294   :  { %v4580_v1 = vcombine.high %v1775_v60, %v1779_v61  ;;  %v4579_v13 = vcombine.low %v1775_v60, %v1779_v61  ;;  %v5466_v60 = vpack.c.bf16 %v1552_v52, %v1552_v52 }
 0x296   :  { %3186 = vmatpush1.bf16.msra.mxu0 %v4521_v4  ;;  %3268 = vmatpush1.bf16.msra.mxu1 %v4523_v5  ;;  %v1786_v4 = vld [vmem:[#allocation6 + $0x720] sm:$0xff]  ;;  %v1783_v5 = vld [vmem:[#allocation6 + $0x708] sm:$0xff] }
 0x297   :  { %3187 = vmatprep.subr.bf16.mxu0 %v4530_v10  ;;  %3269 = vmatprep.subr.bf16.mxu1 %v4532_v11  ;;  %v1787_v10 = vld [vmem:[#allocation6 + $0x728] sm:$0xff]  ;;  %v4577_v11 = vcombine.low %v1774_v58, %v1778_v59  ;;  %v4586_v14 = vcombine.high %v1782_v2, %v1786_v4  ;;  %v1573_v58 = vld [vmem:[#allocation6 + $0x78] sm:$0xff] }
 0x298   :  { %v4588_v15 = vcombine.high %v1783_v5, %v1787_v10  ;;  %v4587_v24 = vcombine.low %v1783_v5, %v1787_v10 }
 0x29a   :  { %3188 = vmatpush1.bf16.msra.mxu0 %v4529_v18  ;;  %3270 = vmatpush1.bf16.msra.mxu1 %v4531_v20  ;;  %v1794_v18 = vld [vmem:[#allocation6 + $0x760] sm:$0xff]  ;;  %v1791_v20 = vld [vmem:[#allocation6 + $0x748] sm:$0xff] }
 0x29b   :  { %3189 = vmatprep.subr.bf16.mxu0 %v4538_v21  ;;  %3271 = vmatprep.subr.bf16.mxu1 %v4540_v22  ;;  %v1795_v21 = vld [vmem:[#allocation6 + $0x768] sm:$0xff]  ;;  %v4585_v22 = vcombine.low %v1782_v2, %v1786_v4  ;;  %v4594_v26 = vcombine.high %v1790_v16, %v1794_v18  ;;  %v4593_v32 = vcombine.low %v1790_v16, %v1794_v18  ;;  %v1581_v2 = vld [vmem:[#allocation6 + $0xb8] sm:$0xff] }
 0x29c   :  { %v4596_v27 = vcombine.high %v1791_v20, %v1795_v21  ;;  %v4595_v33 = vcombine.low %v1791_v20, %v1795_v21  ;;  %v1589_v16 = vld [vmem:[#allocation6 + $0xf8] sm:$0xff] }
 0x29e   :  { %3190 = vmatpush1.bf16.msra.mxu0 %v4537_v28  ;;  %3272 = vmatpush1.bf16.msra.mxu1 %v4539_v29  ;;  %v1798_v28 = vld [vmem:[#allocation6 + $0x780] sm:$0xff] }
 0x29f   :  { %3191 = vmatprep.subr.bf16.mxu0 %v4546_v30  ;;  %3273 = vmatprep.subr.bf16.mxu1 %v4548_v31  ;;  %v1802_v29 = vld [vmem:[#allocation6 + $0x7a0] sm:$0xff]  ;;  %v1799_v30 = vld [vmem:[#allocation6 + $0x788] sm:$0xff] }
 0x2a0   :  { %v1803_v31 = vld [vmem:[#allocation6 + $0x7a8] sm:$0xff]  ;;  %v4602_v38 = vcombine.high %v1798_v28, %v1802_v29  ;;  %v4601_v19 = vcombine.low %v1798_v28, %v1802_v29 }
 0x2a1   :  { %v4603_v49 = vcombine.low %v1799_v30, %v1803_v31 }
 0x2a2   :  { %3192 = vmatpush1.bf16.msra.mxu0 %v4545_v39  ;;  %3274 = vmatpush1.bf16.msra.mxu1 %v4547_v41  ;;  %v4604_v39 = vcombine.high %v1799_v30, %v1803_v31  ;;  %v1806_v41 = vld [vmem:[#allocation6 + $0x7c0] sm:$0xff]  ;;  %v1600_v31 = vld [vmem:[#allocation6 + $0x150] sm:$0xff] }
 0x2a3   :  { %3193 = vmatprep.subr.bf16.mxu0 %v4554_v17  ;;  %3275 = vmatprep.subr.bf16.mxu1 %v4556_v8  ;;  %v1807_v17 = vld [vmem:[#allocation6 + $0x7c8] sm:$0xff]  ;;  %v4610_v45 = vcombine.high %v1806_v41, %v1810_v3  ;;  %v4609_v50 = vcombine.low %v1806_v41, %v1810_v3 }
 0x2a4   :  { %v1811_v8 = vld [vmem:[#allocation6 + $0x7e8] sm:$0xff] }
 0x2a5   :  { %v4611_v51 = vcombine.low %v1807_v17, %v1811_v8 }
 0x2a6   :  { %3194 = vmatpush1.bf16.msra.mxu0 %v4553_v46  ;;  %3276 = vmatpush1.bf16.msra.mxu1 %v4555_v40  ;;  %v4612_v46 = vcombine.high %v1807_v17, %v1811_v8  ;;  %v1560_v40 = vld [vmem:[#allocation6 + $0x10] sm:$0xff] }
 0x2a7   :  { %3195 = vmatprep.subr.bf16.mxu0 %v4562_v47  ;;  %3277 = vmatprep.subr.bf16.mxu1 %v4564_v48  ;;  %v1564_v47 = vld [vmem:[#allocation6 + $0x30] sm:$0xff]  ;;  %v1565_v48 = vld [vmem:[#allocation6 + $0x38] sm:$0xff] }
 0x2a8   :  { %v4366_v53 = vcombine.high %v1560_v40, %v1564_v47  ;;  %v4365_v59 = vcombine.low %v1560_v40, %v1564_v47  ;;  %v4367_v61 = vcombine.low %v1561_v12, %v1565_v48  ;;  %v1608_v17 = vld [vmem:[#allocation6 + $0x190] sm:$0xff] }
 0x2a9   :  { %v1612_v8 = vld [vmem:[#allocation6 + $0x1b0] sm:$0xff] }
 0x2aa   :  { %3196 = vmatpush1.bf16.msra.mxu0 %v4561_v54  ;;  %3278 = vmatpush1.bf16.msra.mxu1 %v4563_v55  ;;  %v4368_v54 = vcombine.high %v1561_v12, %v1565_v48  ;;  %v1568_v55 = vld [vmem:[#allocation6 + $0x50] sm:$0xff]  ;;  %v1617_v48 = vld [vmem:[#allocation6 + $0x1d8] sm:$0xff] }
 0x2ab   :  { %3197 = vmatprep.subr.bf16.mxu0 %v4570_v56  ;;  %3279 = vmatprep.subr.bf16.mxu1 %v4572_v57  ;;  %v1572_v56 = vld [vmem:[#allocation6 + $0x70] sm:$0xff]  ;;  %v1569_v57 = vld [vmem:[#allocation6 + $0x58] sm:$0xff] }
 0x2ac   :  { %v4373_v4 = vcombine.low %v1568_v55, %v1572_v56  ;;  %v4375_v5 = vcombine.low %v1569_v57, %v1573_v58  ;;  %v1616_v47 = vld [vmem:[#allocation6 + $0x1d0] sm:$0xff] }
 0x2ad   :  { %v1620_v12 = vld [vmem:[#allocation6 + $0x1f0] sm:$0xff] }
 0x2ae   :  { %3198 = vmatpush1.bf16.msra.mxu0 %v4569_v62  ;;  %3280 = vmatpush1.bf16.msra.mxu1 %v4571_v63  ;;  %v4374_v62 = vcombine.high %v1568_v55, %v1572_v56  ;;  %v4376_v63 = vcombine.high %v1569_v57, %v1573_v58  ;;  %v1624_v55 = vld [vmem:[#allocation6 + $0x210] sm:$0xff]  ;;  %v1625_v57 = vld [vmem:[#allocation6 + $0x218] sm:$0xff] }
 0x2af   :  { %3199 = vmatprep.subr.bf16.mxu0 %v4578_v0  ;;  %3281 = vmatprep.subr.bf16.mxu1 %v4580_v1  ;;  %v1576_v0 = vld [vmem:[#allocation6 + $0x90] sm:$0xff]  ;;  %v1577_v1 = vld [vmem:[#allocation6 + $0x98] sm:$0xff] }
 0x2b0   :  { %v4382_v10 = vcombine.high %v1576_v0, %v1580_v43  ;;  %v4381_v18 = vcombine.low %v1576_v0, %v1580_v43  ;;  %v4383_v20 = vcombine.low %v1577_v1, %v1581_v2  ;;  %v1628_v56 = vld [vmem:[#allocation6 + $0x230] sm:$0xff]  ;;  %v1629_v58 = vld [vmem:[#allocation6 + $0x238] sm:$0xff] }
 0x2b1   :  { %v1632_v0 = vld [vmem:[#allocation6 + $0x250] sm:$0xff] }
 0x2b2   :  { %3200 = vmatpush1.bf16.msra.mxu0 %v4577_v11  ;;  %3282 = vmatpush1.bf16.msra.mxu1 %v4579_v13  ;;  %v4384_v11 = vcombine.high %v1577_v1, %v1581_v2  ;;  %v1584_v13 = vld [vmem:[#allocation6 + $0xd0] sm:$0xff]  ;;  %v1633_v1 = vld [vmem:[#allocation6 + $0x258] sm:$0xff] }
 0x2b3   :  { %3201 = vmatprep.subr.bf16.mxu0 %v4586_v14  ;;  %3283 = vmatprep.subr.bf16.mxu1 %v4588_v15  ;;  %v1588_v14 = vld [vmem:[#allocation6 + $0xf0] sm:$0xff]  ;;  %v1585_v15 = vld [vmem:[#allocation6 + $0xd8] sm:$0xff] }
 0x2b4   :  { %v4390_v21 = vcombine.high %v1584_v13, %v1588_v14  ;;  %v4391_v28 = vcombine.low %v1585_v15, %v1589_v16  ;;  %v1636_v43 = vld [vmem:[#allocation6 + $0x270] sm:$0xff]  ;;  %v1637_v2 = vld [vmem:[#allocation6 + $0x278] sm:$0xff] }
 0x2b6   :  { %3202 = vmatpush1.bf16.msra.mxu0 %v4585_v22  ;;  %3284 = vmatpush1.bf16.msra.mxu1 %v4587_v24  ;;  %v4392_v22 = vcombine.high %v1585_v15, %v1589_v16  ;;  %v1592_v24 = vld [vmem:[#allocation6 + $0x110] sm:$0xff]  ;;  %v1641_v15 = vld [vmem:[#allocation6 + $0x298] sm:$0xff] }
 0x2b7   :  { %3203 = vmatprep.subr.bf16.mxu0 %v4594_v26  ;;  %3285 = vmatprep.subr.bf16.mxu1 %v4596_v27  ;;  %v1597_v26 = vld [vmem:[#allocation6 + $0x138] sm:$0xff]  ;;  %v4389_v27 = vcombine.low %v1584_v13, %v1588_v14  ;;  %v4398_v29 = vcombine.high %v1592_v24, %v1596_v25  ;;  %v1640_v13 = vld [vmem:[#allocation6 + $0x290] sm:$0xff] }
 0x2b8   :  { %v1644_v14 = vld [vmem:[#allocation6 + $0x2b0] sm:$0xff]  ;;  %v1645_v16 = vld [vmem:[#allocation6 + $0x2b8] sm:$0xff] }
 0x2ba   :  { %3204 = vmatpush1.bf16.msra.mxu0 %v4593_v32  ;;  %3286 = vmatpush1.bf16.msra.mxu1 %v4595_v33  ;;  %v1604_v32 = vld [vmem:[#allocation6 + $0x170] sm:$0xff]  ;;  %v1601_v33 = vld [vmem:[#allocation6 + $0x158] sm:$0xff] }
 0x2bb   :  { %3205 = vmatprep.subr.bf16.mxu0 %v4602_v38  ;;  %3287 = vmatprep.subr.bf16.mxu1 %v4604_v39  ;;  %v4397_v38 = vcombine.low %v1592_v24, %v1596_v25  ;;  %v4406_v41 = vcombine.high %v1600_v31, %v1604_v32  ;;  %v4408_v3 = vcombine.high %v1601_v33, %v1605_v35  ;;  %v1648_v24 = vld [vmem:[#allocation6 + $0x2d0] sm:$0xff] }
 0x2bc   :  { %v4405_v44 = vcombine.low %v1600_v31, %v1604_v32  ;;  %v1652_v25 = vld [vmem:[#allocation6 + $0x2f0] sm:$0xff] }
 0x2bd   :  { %v1656_v31 = vld [vmem:[#allocation6 + $0x310] sm:$0xff] }
 0x2be   :  { %3206 = vmatpush1.bf16.msra.mxu0 %v4601_v19  ;;  %3288 = vmatpush1.bf16.msra.mxu1 %v4603_v49  ;;  %v1609_v19 = vld [vmem:[#allocation6 + $0x198] sm:$0xff]  ;;  %v1660_v32 = vld [vmem:[#allocation6 + $0x330] sm:$0xff] }
 0x2bf   :  { %3207 = vmatprep.subr.bf16.mxu0 %v4610_v45  ;;  %3289 = vmatprep.subr.bf16.mxu1 %v4612_v46  ;;  %v1613_v49 = vld [vmem:[#allocation6 + $0x1b8] sm:$0xff]  ;;  %v4407_v45 = vcombine.low %v1601_v33, %v1605_v35  ;;  %v4414_v46 = vcombine.high %v1608_v17, %v1612_v8 }
 0x2c0   :  { %v4416_v40 = vcombine.high %v1609_v19, %v1613_v49  ;;  %v4415_v52 = vcombine.low %v1609_v19, %v1613_v49  ;;  %v1657_v33 = vld [vmem:[#allocation6 + $0x318] sm:$0xff] }
 0x2c1   :  { %v1661_v35 = vld [vmem:[#allocation6 + $0x338] sm:$0xff] }
 0x2c2   :  { %3208 = vmatpush1.bf16.msra.mxu0 %v4609_v50  ;;  %3290 = vmatpush1.bf16.msra.mxu1 %v4611_v51  ;;  %v1621_v50 = vld [vmem:[#allocation6 + $0x1f8] sm:$0xff]  ;;  %v4413_v51 = vcombine.low %v1608_v17, %v1612_v8  ;;  %v1664_v17 = vld [vmem:[#allocation6 + $0x350] sm:$0xff] }
 0x2c3   :  { %3300 = vmatprep.subr.bf16.mxu0 %v4366_v53  ;;  %3382 = vmatprep.subr.bf16.mxu1 %v4368_v54  ;;  %v4422_v53 = vcombine.high %v1616_v47, %v1620_v12  ;;  %v4424_v54 = vcombine.high %v1617_v48, %v1621_v50  ;;  %v1668_v8 = vld [vmem:[#allocation6 + $0x370] sm:$0xff]  ;;  %v1665_v19 = vld [vmem:[#allocation6 + $0x358] sm:$0xff] }
 0x2c4   :  { %v1669_v49 = vld [vmem:[#allocation6 + $0x378] sm:$0xff] }
 0x2c5   :  { %3210 = vmatmul.mubr.bf16.vlgmr.msra.gmra.mrb[8].mxu0 %v5466_v60  ;;  %3292 = vmatmul.mubr.bf16.vlgmr.msra.gmra.mrb[8].mxu1 %v5466_v60 }
 0x2c6   :  { %3301 = vmatpush1.bf16.msra.mxu0 %v4365_v59  ;;  %3332 = vmatprep.mubr.bf16.mxu0 %v5450_v36  ;;  %v4421_v59 = vcombine.low %v1616_v47, %v1620_v12  ;;  %v1672_v47 = vld [vmem:[#allocation6 + $0x390] sm:$0xff] }
 0x2c7   :  { %3383 = vmatpush1.bf16.msra.mxu1 %v4367_v61  ;;  %3414 = vmatprep.mubr.bf16.mxu1 %v5450_v36  ;;  %v1593_v36 = vld [vmem:[#allocation6 + $0x118] sm:$0xff]  ;;  %v4423_v61 = vcombine.low %v1617_v48, %v1621_v50  ;;  %v1676_v12 = vld [vmem:[#allocation6 + $0x3b0] sm:$0xff] }
 0x2c8   :  { %3302 = vmatprep.subr.bf16.mxu0 %v4374_v62  ;;  %3384 = vmatprep.subr.bf16.mxu1 %v4376_v63  ;;  %v4400_v30 = vcombine.high %v1593_v36, %v1597_v26  ;;  %v4399_v39 = vcombine.low %v1593_v36, %v1597_v26  ;;  %v4430_v62 = vcombine.high %v1624_v55, %v1628_v56  ;;  %v1649_v36 = vld [vmem:[#allocation6 + $0x2d8] sm:$0xff] }
 0x2c9   :  { %v4432_v63 = vcombine.high %v1625_v57, %v1629_v58  ;;  %v1653_v26 = vld [vmem:[#allocation6 + $0x2f8] sm:$0xff] }
 0x2ca   :  { %3303 = vmatpush1.bf16.msra.mxu0 %v4373_v4  ;;  %v4429_v4 = vcombine.low %v1624_v55, %v1628_v56  ;;  %v1673_v48 = vld [vmem:[#allocation6 + $0x398] sm:$0xff]  ;;  %v1680_v55 = vld [vmem:[#allocation6 + $0x3d0] sm:$0xff] }
 0x2cb   :  { %3385 = vmatpush1.bf16.msra.mxu1 %v4375_v5  ;;  %3304 = vmatprep.subr.bf16.mxu0 %v4382_v10  ;;  %v4431_v5 = vcombine.low %v1625_v57, %v1629_v58  ;;  %v4438_v10 = vcombine.high %v1632_v0, %v1636_v43  ;;  %v1677_v50 = vld [vmem:[#allocation6 + $0x3b8] sm:$0xff]  ;;  %v1684_v56 = vld [vmem:[#allocation6 + $0x3f0] sm:$0xff] }
 0x2cc   :  { %3386 = vmatprep.subr.bf16.mxu1 %v4384_v11  ;;  %v4440_v11 = vcombine.high %v1633_v1, %v1637_v2  ;;  %v1681_v57 = vld [vmem:[#allocation6 + $0x3d8] sm:$0xff] }
 0x2cd   :  { %v1685_v58 = vld [vmem:[#allocation6 + $0x3f8] sm:$0xff] }
 0x2ce   :  { %3305 = vmatpush1.bf16.msra.mxu0 %v4381_v18  ;;  %v4437_v18 = vcombine.low %v1632_v0, %v1636_v43  ;;  %v1688_v0 = vld [vmem:[#allocation6 + $0x410] sm:$0xff] }
 0x2cf   :  { %3387 = vmatpush1.bf16.msra.mxu1 %v4383_v20  ;;  %3306 = vmatprep.subr.bf16.mxu0 %v4390_v21  ;;  %v4439_v20 = vcombine.low %v1633_v1, %v1637_v2  ;;  %v4446_v21 = vcombine.high %v1640_v13, %v1644_v14  ;;  %v1692_v43 = vld [vmem:[#allocation6 + $0x430] sm:$0xff]  ;;  %v1689_v1 = vld [vmem:[#allocation6 + $0x418] sm:$0xff] }
 0x2d0   :  { %3388 = vmatprep.subr.bf16.mxu1 %v4392_v22  ;;  %v4448_v22 = vcombine.high %v1641_v15, %v1645_v16  ;;  %v1693_v2 = vld [vmem:[#allocation6 + $0x438] sm:$0xff] }
 0x2d2   :  { %3307 = vmatpush1.bf16.msra.mxu0 %v4389_v27  ;;  %v4445_v27 = vcombine.low %v1640_v13, %v1644_v14  ;;  %v1696_v13 = vld [vmem:[#allocation6 + $0x450] sm:$0xff] }
 0x2d3   :  { %3389 = vmatpush1.bf16.msra.mxu1 %v4391_v28  ;;  %3308 = vmatprep.subr.bf16.mxu0 %v4398_v29  ;;  %v4447_v28 = vcombine.low %v1641_v15, %v1645_v16  ;;  %v4454_v29 = vcombine.high %v1648_v24, %v1652_v25  ;;  %v1700_v14 = vld [vmem:[#allocation6 + $0x470] sm:$0xff]  ;;  %v4493_v15 = vcombine.low %v1688_v0, %v1692_v43  ;;  %v1697_v16 = vld [vmem:[#allocation6 + $0x458] sm:$0xff] }
 0x2d4   :  { %3390 = vmatprep.subr.bf16.mxu1 %v4400_v30  ;;  %v4456_v30 = vcombine.high %v1649_v36, %v1653_v26 }
 0x2d6   :  { %3309 = vmatpush1.bf16.msra.mxu0 %v4397_v38  ;;  %v4453_v38 = vcombine.low %v1648_v24, %v1652_v25  ;;  %v1708_v24 = vld [vmem:[#allocation6 + $0x4b0] sm:$0xff] }
 0x2d7   :  { %3391 = vmatpush1.bf16.msra.mxu1 %v4399_v39  ;;  %3310 = vmatprep.subr.bf16.mxu0 %v4406_v41  ;;  %v4455_v39 = vcombine.low %v1649_v36, %v1653_v26  ;;  %v4462_v41 = vcombine.high %v1656_v31, %v1660_v32  ;;  %v1705_v36 = vld [vmem:[#allocation6 + $0x498] sm:$0xff] }
 0x2d8   :  { %3392 = vmatprep.subr.bf16.mxu1 %v4408_v3  ;;  %v4464_v3 = vcombine.high %v1657_v33, %v1661_v35  ;;  %v1709_v26 = vld [vmem:[#allocation6 + $0x4b8] sm:$0xff] }
 0x2da   :  { %3311 = vmatpush1.bf16.msra.mxu0 %v4405_v44  ;;  %v4461_v44 = vcombine.low %v1656_v31, %v1660_v32  ;;  %v1712_v31 = vld [vmem:[#allocation6 + $0x4d0] sm:$0xff] }
 0x2db   :  { %3393 = vmatpush1.bf16.msra.mxu1 %v4407_v45  ;;  %3312 = vmatprep.subr.bf16.mxu0 %v4414_v46  ;;  %v4463_v45 = vcombine.low %v1657_v33, %v1661_v35  ;;  %v4470_v46 = vcombine.high %v1664_v17, %v1668_v8  ;;  %v1716_v32 = vld [vmem:[#allocation6 + $0x4f0] sm:$0xff]  ;;  %v1713_v33 = vld [vmem:[#allocation6 + $0x4d8] sm:$0xff] }
 0x2dc   :  { %3394 = vmatprep.subr.bf16.mxu1 %v4416_v40  ;;  %v4472_v40 = vcombine.high %v1665_v19, %v1669_v49  ;;  %v1717_v35 = vld [vmem:[#allocation6 + $0x4f8] sm:$0xff] }
 0x2de   :  { %3313 = vmatpush1.bf16.msra.mxu0 %v4413_v51  ;;  %v4469_v51 = vcombine.low %v1664_v17, %v1668_v8  ;;  %v1724_v17 = vld [vmem:[#allocation6 + $0x530] sm:$0xff]  ;;  %v1721_v8 = vld [vmem:[#allocation6 + $0x518] sm:$0xff] }
 0x2df   :  { %3395 = vmatpush1.bf16.msra.mxu1 %v4415_v52  ;;  %3314 = vmatprep.subr.bf16.mxu0 %v4422_v53  ;;  %v4471_v52 = vcombine.low %v1665_v19, %v1669_v49  ;;  %v4478_v53 = vcombine.high %v1672_v47, %v1676_v12  ;;  %v1725_v19 = vld [vmem:[#allocation6 + $0x538] sm:$0xff]  ;;  %v4519_v49 = vcombine.low %v1713_v33, %v1717_v35 }
 0x2e0   :  { %3396 = vmatprep.subr.bf16.mxu1 %v4424_v54  ;;  %v4480_v54 = vcombine.high %v1673_v48, %v1677_v50 }
 0x2e2   :  { %3315 = vmatpush1.bf16.msra.mxu0 %v4421_v59  ;;  %v4477_v59 = vcombine.low %v1672_v47, %v1676_v12  ;;  %v1729_v47 = vld [vmem:[#allocation6 + $0x558] sm:$0xff] }
 0x2e3   :  { %3397 = vmatpush1.bf16.msra.mxu1 %v4423_v61  ;;  %3316 = vmatprep.subr.bf16.mxu0 %v4430_v62  ;;  %v4479_v61 = vcombine.low %v1673_v48, %v1677_v50  ;;  %v4486_v62 = vcombine.high %v1680_v55, %v1684_v56  ;;  %v1733_v12 = vld [vmem:[#allocation6 + $0x578] sm:$0xff]  ;;  %v4527_v50 = vcombine.low %v1721_v8, %v1725_v19 }
 0x2e4   :  { %3398 = vmatprep.subr.bf16.mxu1 %v4432_v63  ;;  %v4488_v63 = vcombine.high %v1681_v57, %v1685_v58 }
 0x2e6   :  { %3317 = vmatpush1.bf16.msra.mxu0 %v4429_v4  ;;  %v4485_v4 = vcombine.low %v1680_v55, %v1684_v56  ;;  %v1737_v55 = vld [vmem:[#allocation6 + $0x598] sm:$0xff] }
 0x2e7   :  { %3399 = vmatpush1.bf16.msra.mxu1 %v4431_v5  ;;  %3318 = vmatprep.subr.bf16.mxu0 %v4438_v10  ;;  %v4487_v5 = vcombine.low %v1681_v57, %v1685_v58  ;;  %v4494_v10 = vcombine.high %v1688_v0, %v1692_v43  ;;  %v1741_v56 = vld [vmem:[#allocation6 + $0x5b8] sm:$0xff]  ;;  %v4535_v58 = vcombine.low %v1729_v47, %v1733_v12 }
 0x2e8   :  { %3400 = vmatprep.subr.bf16.mxu1 %v4440_v11  ;;  %v4496_v11 = vcombine.high %v1689_v1, %v1693_v2  ;;  %v1745_v0 = vld [vmem:[#allocation6 + $0x5d8] sm:$0xff] }
 0x2e9   :  { %v1749_v43 = vld [vmem:[#allocation6 + $0x5f8] sm:$0xff] }
 0x2ea   :  { %3319 = vmatpush1.bf16.msra.mxu0 %v4437_v18  ;;  %v1701_v18 = vld [vmem:[#allocation6 + $0x478] sm:$0xff] }
 0x2eb   :  { %3401 = vmatpush1.bf16.msra.mxu1 %v4439_v20  ;;  %3320 = vmatprep.subr.bf16.mxu0 %v4446_v21  ;;  %v4495_v20 = vcombine.low %v1689_v1, %v1693_v2  ;;  %v4502_v21 = vcombine.high %v1696_v13, %v1700_v14  ;;  %v4504_v25 = vcombine.high %v1697_v16, %v1701_v18 }
 0x2ec   :  { %3402 = vmatprep.subr.bf16.mxu1 %v4448_v22  ;;  %v1704_v22 = vld [vmem:[#allocation6 + $0x490] sm:$0xff]  ;;  %v4543_v2 = vcombine.low %v1737_v55, %v1741_v56 }
 0x2ee   :  { %3321 = vmatpush1.bf16.msra.mxu0 %v4445_v27  ;;  %v4501_v27 = vcombine.low %v1696_v13, %v1700_v14  ;;  %v1753_v13 = vld [vmem:[#allocation6 + $0x618] sm:$0xff] }
 0x2ef   :  { %3403 = vmatpush1.bf16.msra.mxu1 %v4447_v28  ;;  %3322 = vmatprep.subr.bf16.mxu0 %v4454_v29  ;;  %v4503_v28 = vcombine.low %v1697_v16, %v1701_v18  ;;  %v4510_v29 = vcombine.high %v1704_v22, %v1708_v24  ;;  %v1757_v14 = vld [vmem:[#allocation6 + $0x638] sm:$0xff]  ;;  %v4551_v16 = vcombine.low %v1745_v0, %v1749_v43 }
 0x2f0   :  { %3404 = vmatprep.subr.bf16.mxu1 %v4456_v30  ;;  %v4512_v30 = vcombine.high %v1705_v36, %v1709_v26 }
 0x2f2   :  { %3323 = vmatpush1.bf16.msra.mxu0 %v4453_v38  ;;  %v4509_v38 = vcombine.low %v1704_v22, %v1708_v24  ;;  %v1764_v22 = vld [vmem:[#allocation6 + $0x670] sm:$0xff]  ;;  %v1761_v24 = vld [vmem:[#allocation6 + $0x658] sm:$0xff] }
 0x2f3   :  { %3405 = vmatpush1.bf16.msra.mxu1 %v4455_v39  ;;  %3324 = vmatprep.subr.bf16.mxu0 %v4462_v41  ;;  %v4518_v39 = vcombine.high %v1712_v31, %v1716_v32  ;;  %v4520_v41 = vcombine.high %v1713_v33, %v1717_v35 }
 0x2f4   :  { %3406 = vmatprep.subr.bf16.mxu1 %v4464_v3  ;;  %v1720_v3 = vld [vmem:[#allocation6 + $0x510] sm:$0xff] }
 0x2f5   :  { %v4525_v48 = vcombine.low %v1720_v3, %v1724_v17 }
 0x2f6   :  { %3325 = vmatpush1.bf16.msra.mxu0 %v4461_v44  ;;  %v4526_v44 = vcombine.high %v1720_v3, %v1724_v17  ;;  %v1777_v3 = vld [vmem:[#allocation6 + $0x6d8] sm:$0xff] }
 0x2f7   :  { %3407 = vmatpush1.bf16.msra.mxu1 %v4463_v45  ;;  %3326 = vmatprep.subr.bf16.mxu0 %v4470_v46  ;;  %v4528_v45 = vcombine.high %v1721_v8, %v1725_v19  ;;  %v1728_v46 = vld [vmem:[#allocation6 + $0x550] sm:$0xff]  ;;  %v1781_v17 = vld [vmem:[#allocation6 + $0x6f8] sm:$0xff] }
 0x2f8   :  { %3408 = vmatprep.subr.bf16.mxu1 %v4472_v40  ;;  %v1732_v40 = vld [vmem:[#allocation6 + $0x570] sm:$0xff] }
 0x2f9   :  { %v4533_v57 = vcombine.low %v1728_v46, %v1732_v40 }
 0x2fa   :  { %3327 = vmatpush1.bf16.msra.mxu0 %v4469_v51  ;;  %v4534_v51 = vcombine.high %v1728_v46, %v1732_v40  ;;  %v1785_v46 = vld [vmem:[#allocation6 + $0x718] sm:$0xff] }
 0x2fb   :  { %3409 = vmatpush1.bf16.msra.mxu1 %v4471_v52  ;;  %3328 = vmatprep.subr.bf16.mxu0 %v4478_v53  ;;  %v4536_v52 = vcombine.high %v1729_v47, %v1733_v12  ;;  %v1736_v53 = vld [vmem:[#allocation6 + $0x590] sm:$0xff]  ;;  %v1789_v40 = vld [vmem:[#allocation6 + $0x738] sm:$0xff]  ;;  %v4583_v12 = vcombine.low %v1777_v3, %v1781_v17 }
 0x2fc   :  { %3410 = vmatprep.subr.bf16.mxu1 %v4480_v54  ;;  %v1740_v54 = vld [vmem:[#allocation6 + $0x5b0] sm:$0xff] }
 0x2fd   :  { %v4541_v1 = vcombine.low %v1736_v53, %v1740_v54 }
 0x2fe   :  { %3329 = vmatpush1.bf16.msra.mxu0 %v4477_v59  ;;  %v4542_v59 = vcombine.high %v1736_v53, %v1740_v54  ;;  %v1793_v53 = vld [vmem:[#allocation6 + $0x758] sm:$0xff] }
 0x2ff   :  { %3411 = vmatpush1.bf16.msra.mxu1 %v4479_v61  ;;  %3330 = vmatprep.subr.bf16.mxu0 %v4486_v62  ;;  %v4544_v61 = vcombine.high %v1737_v55, %v1741_v56  ;;  %v1744_v62 = vld [vmem:[#allocation6 + $0x5d0] sm:$0xff]  ;;  %v1797_v54 = vld [vmem:[#allocation6 + $0x778] sm:$0xff]  ;;  %v4591_v56 = vcombine.low %v1785_v46, %v1789_v40 }
 0x300   :  { %3412 = vmatprep.subr.bf16.mxu1 %v4488_v63  ;;  %v1748_v63 = vld [vmem:[#allocation6 + $0x5f0] sm:$0xff] }
 0x302   :  { %3331 = vmatpush1.bf16.msra.mxu0 %v4485_v4  ;;  %v4550_v4 = vcombine.high %v1744_v62, %v1748_v63 }
 0x303   :  { %3413 = vmatpush1.bf16.msra.mxu1 %v4487_v5  ;;  %3341 = vmatprep.subr.bf16.mxu0 %v4494_v10  ;;  %v4552_v5 = vcombine.high %v1745_v0, %v1749_v43  ;;  %v1752_v10 = vld [vmem:[#allocation6 + $0x610] sm:$0xff]  ;;  %v4599_v43 = vcombine.low %v1793_v53, %v1797_v54 }
 0x304   :  { %3423 = vmatprep.subr.bf16.mxu1 %v4496_v11  ;;  %v1756_v11 = vld [vmem:[#allocation6 + $0x630] sm:$0xff] }
 0x305   :  { %3333 = vmatmul.mubr.bf16.vlgmr.msra.gmra.mrb[12].mxu0 %v5452_v37  ;;  %v4558_v18 = vcombine.high %v1752_v10, %v1756_v11 }
 0x306   :  { %3415 = vmatmul.mubr.bf16.vlgmr.msra.gmra.mrb[12].mxu1 %v5452_v37  ;;  %3342 = vmatpush1.bf16.msra.mxu0 %v4493_v15  ;;  %v4511_v37 = vcombine.low %v1705_v36, %v1709_v26  ;;  %v4549_v15 = vcombine.low %v1744_v62, %v1748_v63  ;;  %v4557_v36 = vcombine.low %v1752_v10, %v1756_v11  ;;  %v1801_v62 = vld [vmem:[#allocation6 + $0x798] sm:$0xff] }
 0x307   :  { %3373 = vmatprep.mubr.bf16.mxu0 %v5456_v42  ;;  %3424 = vmatpush1.bf16.msra.mxu1 %v4495_v20  ;;  %v4560_v20 = vcombine.high %v1753_v13, %v1757_v14  ;;  %v4559_v26 = vcombine.low %v1753_v13, %v1757_v14  ;;  %v1805_v63 = vld [vmem:[#allocation6 + $0x7b8] sm:$0xff] }
 0x308   :  { %3455 = vmatprep.mubr.bf16.mxu1 %v5456_v42  ;;  %3343 = vmatprep.subr.bf16.mxu0 %v4502_v21  ;;  %v4517_v42 = vcombine.low %v1712_v31, %v1716_v32  ;;  %v1760_v21 = vld [vmem:[#allocation6 + $0x650] sm:$0xff]  ;;  %v1769_v31 = vld [vmem:[#allocation6 + $0x698] sm:$0xff]  ;;  %v4607_v14 = vcombine.low %v1801_v62, %v1805_v63 }
 0x309   :  { %3425 = vmatprep.subr.bf16.mxu1 %v4504_v25  ;;  %v1765_v25 = vld [vmem:[#allocation6 + $0x678] sm:$0xff]  ;;  %v4565_v33 = vcombine.low %v1760_v21, %v1764_v22 }
 0x30a   :  { %3344 = vmatpush1.bf16.msra.mxu0 %v4501_v27  ;;  %v4566_v27 = vcombine.high %v1760_v21, %v1764_v22  ;;  %v1773_v32 = vld [vmem:[#allocation6 + $0x6b8] sm:$0xff]  ;;  %v4567_v35 = vcombine.low %v1761_v24, %v1765_v25  ;;  %v5106_v21 = vld [vmem:[#allocation7 + $0x40] sm:$0xff]  }
 0x30b   :  { %3426 = vmatpush1.bf16.msra.mxu1 %v4503_v28  ;;  %3345 = vmatprep.subr.bf16.mxu0 %v4510_v29  ;;  %v4568_v28 = vcombine.high %v1761_v24, %v1765_v25  ;;  %v1768_v29 = vld [vmem:[#allocation6 + $0x690] sm:$0xff]  ;;  %v4575_v19 = vcombine.low %v1769_v31, %v1773_v32  ;;  %v1809_v10 = vld [vmem:[#allocation6 + $0x7d8] sm:$0xff]  ;;  %v5107_v22 = vld [vmem:[#allocation7 + $0xc0] sm:$0xff]  }
 0x30c   :  { %3427 = vmatprep.subr.bf16.mxu1 %v4512_v30  ;;  %v1772_v30 = vld [vmem:[#allocation6 + $0x6b0] sm:$0xff]  ;;  %v1813_v11 = vld [vmem:[#allocation6 + $0x7f8] sm:$0xff]  ;;  %v5108_v24 = vld [vmem:[#allocation7] sm:$0xff]  }
 0x30d   :  { %v4573_v8 = vcombine.low %v1768_v29, %v1772_v30  ;;  %v5109_v25 = vld [vmem:[#allocation7 + $0x80] sm:$0xff]  }
 0x30e   :  { %3346 = vmatpush1.bf16.msra.mxu0 %v4509_v38  ;;  %v4574_v38 = vcombine.high %v1768_v29, %v1772_v30  ;;  %v5114_v29 = vld [vmem:[#allocation7 + $0x50] sm:$0xff]  }
 0x30f   :  { %3428 = vmatpush1.bf16.msra.mxu1 %v4511_v37  ;;  %3347 = vmatprep.subr.bf16.mxu0 %v4518_v39  ;;  %v4576_v37 = vcombine.high %v1769_v31, %v1773_v32  ;;  %v1776_v39 = vld [vmem:[#allocation6 + $0x6d0] sm:$0xff] }
 0x310   :  { %3429 = vmatprep.subr.bf16.mxu1 %v4520_v41  ;;  %v1780_v41 = vld [vmem:[#allocation6 + $0x6f0] sm:$0xff] }
 0x311   :  { %v4581_v47 = vcombine.low %v1776_v39, %v1780_v41  ;;  %v5115_v30 = vld [vmem:[#allocation7 + $0xd0] sm:$0xff]  }
 0x312   :  { %3348 = vmatpush1.bf16.msra.mxu0 %v4517_v42  ;;  %v4582_v42 = vcombine.high %v1776_v39, %v1780_v41  ;;  %v5116_v31 = vld [vmem:[#allocation7 + $0x10] sm:$0xff]   ;;  %v5123_v39 = vld [vmem:[#allocation7 + $0xe0] sm:$0xff]  }
 0x313   :  { %3430 = vmatpush1.bf16.msra.mxu1 %v4519_v49  ;;  %3349 = vmatprep.subr.bf16.mxu0 %v4526_v44  ;;  %v4584_v49 = vcombine.high %v1777_v3, %v1781_v17  ;;  %v1784_v44 = vld [vmem:[#allocation6 + $0x710] sm:$0xff]  ;;  %v5124_v41 = vld [vmem:[#allocation7 + $0x20] sm:$0xff]   ;;  %v5126_v17 = vld [vmem:[#allocation7 + $0x68] sm:$0xff]  }
 0x314   :  { %3431 = vmatprep.subr.bf16.mxu1 %v4528_v45  ;;  %v1788_v45 = vld [vmem:[#allocation6 + $0x730] sm:$0xff]  ;;  %v5125_v3 = vld [vmem:[#allocation7 + $0xa0] sm:$0xff]  }
 0x315   :  { %v4589_v55 = vcombine.low %v1784_v44, %v1788_v45  ;;  %v5117_v32 = vld [vmem:[#allocation7 + $0x90] sm:$0xff]  }
 0x316   :  { %3350 = vmatpush1.bf16.msra.mxu0 %v4525_v48  ;;  %v4590_v48 = vcombine.high %v1784_v44, %v1788_v45  ;;  %v5131_v44 = vld [vmem:[#allocation7 + $0xf0] sm:$0xff]  }
 0x317   :  { %3432 = vmatpush1.bf16.msra.mxu1 %v4527_v50  ;;  %3351 = vmatprep.subr.bf16.mxu0 %v4534_v51  ;;  %v4592_v50 = vcombine.high %v1785_v46, %v1789_v40  ;;  %v1792_v51 = vld [vmem:[#allocation6 + $0x750] sm:$0xff]  ;;  %v5134_v40 = vld [vmem:[#allocation7 + $0x78] sm:$0xff]  }
 0x318   :  { %3433 = vmatprep.subr.bf16.mxu1 %v4536_v52  ;;  %v1796_v52 = vld [vmem:[#allocation6 + $0x770] sm:$0xff] }
 0x319   :  { %v4597_v0 = vcombine.low %v1792_v51, %v1796_v52  ;;  %v5132_v45 = vld [vmem:[#allocation7 + $0x30] sm:$0xff]  }
 0x31a   :  { %3352 = vmatpush1.bf16.msra.mxu0 %v4533_v57  ;;  %v4598_v57 = vcombine.high %v1792_v51, %v1796_v52  ;;  %v5133_v46 = vld [vmem:[#allocation7 + $0xb0] sm:$0xff]   ;;  %v5139_v51 = vld [vmem:[#allocation7 + $0x1c0] sm:$0xff]  }
 0x31b   :  { %3434 = vmatpush1.bf16.msra.mxu1 %v4535_v58  ;;  %3353 = vmatprep.subr.bf16.mxu0 %v4542_v59  ;;  %v4600_v58 = vcombine.high %v1793_v53, %v1797_v54  ;;  %v1800_v59 = vld [vmem:[#allocation6 + $0x790] sm:$0xff]  ;;  %v5481_v52 = vld [vmem:[%s5511_s6] sm:$0xff] }
 0x31c   :  { %3435 = vmatprep.subr.bf16.mxu1 %v4544_v61  ;;  %v1804_v61 = vld [vmem:[#allocation6 + $0x7b0] sm:$0xff]  ;;  %v1819_v53 = vrot.slane %v5481_v52, %v5391_v7  ;;  %v1827_v54 = vrot.slane %v5481_v52, %v5425_v23 }
 0x31d   :  { %v4605_v13 = vcombine.low %v1800_v59, %v1804_v61 }
 0x31e   :  { %3354 = vmatpush1.bf16.msra.mxu0 %v4541_v1  ;;  %v4606_v1 = vcombine.high %v1800_v59, %v1804_v61 }
 0x31f   :  { %3436 = vmatpush1.bf16.msra.mxu1 %v4543_v2  ;;  %3355 = vmatprep.subr.bf16.mxu0 %v4550_v4  ;;  %v4608_v2 = vcombine.high %v1801_v62, %v1805_v63  ;;  %v1808_v4 = vld [vmem:[#allocation6 + $0x7d0] sm:$0xff] }
 0x320   :  { %3437 = vmatprep.subr.bf16.mxu1 %v4552_v5  ;;  %v1812_v5 = vld [vmem:[#allocation6 + $0x7f0] sm:$0xff] }
 0x322   :  { %3356 = vmatpush1.bf16.msra.mxu0 %v4549_v15  ;;  %v4614_v15 = vcombine.high %v1808_v4, %v1812_v5 }
 0x323   :  { %3438 = vmatpush1.bf16.msra.mxu1 %v4551_v16  ;;  %3357 = vmatprep.subr.bf16.mxu0 %v4558_v18  ;;  %v4616_v16 = vcombine.high %v1809_v10, %v1813_v11  ;;  %v4613_v18 = vcombine.low %v1808_v4, %v1812_v5 }
 0x324   :  { %3439 = vmatprep.subr.bf16.mxu1 %v4560_v20  ;;  %v4615_v20 = vcombine.low %v1809_v10, %v1813_v11 }
 0x326   :  { %3358 = vmatpush1.bf16.msra.mxu0 %v4557_v36  ;;  %v5110_v36 = vld [vmem:[#allocation7 + $0x48] sm:$0xff]  }
 0x327   :  { %3440 = vmatpush1.bf16.msra.mxu1 %v4559_v26  ;;  %3359 = vmatprep.subr.bf16.mxu0 %v4566_v27  ;;  %v5111_v26 = vld [vmem:[#allocation7 + $0xc8] sm:$0xff]  }
 0x328   :  { %3441 = vmatprep.subr.bf16.mxu1 %v4568_v28  ;;  %v5112_v27 = vld [vmem:[#allocation7 + $0x8] sm:$0xff]  }
 0x329   :  { %v5113_v28 = vld [vmem:[#allocation7 + $0x88] sm:$0xff]  }
 0x32a   :  { %3360 = vmatpush1.bf16.msra.mxu0 %v4565_v33  ;;  %v5118_v33 = vld [vmem:[#allocation7 + $0x58] sm:$0xff]  }
 0x32b   :  { %3442 = vmatpush1.bf16.msra.mxu1 %v4567_v35  ;;  %3361 = vmatprep.subr.bf16.mxu0 %v4574_v38  ;;  %v5119_v35 = vld [vmem:[#allocation7 + $0xd8] sm:$0xff]  }
 0x32c   :  { %3443 = vmatprep.subr.bf16.mxu1 %v4576_v37  ;;  %v5120_v38 = vld [vmem:[#allocation7 + $0x18] sm:$0xff]   ;;  %v5122_v37 = vld [vmem:[#allocation7 + $0x60] sm:$0xff]  }
 0x32e   :  { %3362 = vmatpush1.bf16.msra.mxu0 %v4573_v8  ;;  %v5127_v8 = vld [vmem:[#allocation7 + $0xe8] sm:$0xff]  }
 0x32f   :  { %3444 = vmatpush1.bf16.msra.mxu1 %v4575_v19  ;;  %3363 = vmatprep.subr.bf16.mxu0 %v4582_v42  ;;  %v5128_v19 = vld [vmem:[#allocation7 + $0x28] sm:$0xff]  }
 0x330   :  { %3445 = vmatprep.subr.bf16.mxu1 %v4584_v49  ;;  %v5129_v42 = vld [vmem:[#allocation7 + $0xa8] sm:$0xff]   ;;  %v5130_v49 = vld [vmem:[#allocation7 + $0x70] sm:$0xff]  }
 0x332   :  { %3364 = vmatpush1.bf16.msra.mxu0 %v4581_v47  ;;  %v5135_v47 = vld [vmem:[#allocation7 + $0xf8] sm:$0xff]  }
 0x333   :  { %3446 = vmatpush1.bf16.msra.mxu1 %v4583_v12  ;;  %3365 = vmatprep.subr.bf16.mxu0 %v4590_v48  ;;  %v5136_v12 = vld [vmem:[#allocation7 + $0x38] sm:$0xff]  }
 0x334   :  { %3447 = vmatprep.subr.bf16.mxu1 %v4592_v50  ;;  %v5137_v48 = vld [vmem:[#allocation7 + $0xb8] sm:$0xff]   ;;  %v5138_v50 = vld [vmem:[#allocation7 + $0x140] sm:$0xff]  }
 0x336   :  { %3366 = vmatpush1.bf16.msra.mxu0 %v4589_v55  ;;  %v1823_v55 = vrot.slane %v5481_v52, %v5399_v9 }
 0x337   :  { %3448 = vmatpush1.bf16.msra.mxu1 %v4591_v56  ;;  %3367 = vmatprep.subr.bf16.mxu0 %v4598_v57  ;;  %v1831_v56 = vrot.slane %v5481_v52, %v5414_v34  ;;  %v5141_v34 = vld [vmem:[#allocation7 + $0x180] sm:$0xff]  }
 0x338   :  { %3449 = vmatprep.subr.bf16.mxu1 %v4600_v58 }
 0x33a   :  { %3368 = vmatpush1.bf16.msra.mxu0 %v4597_v0 }
 0x33b   :  { %3450 = vmatpush1.bf16.msra.mxu1 %v4599_v43  ;;  %3369 = vmatprep.subr.bf16.mxu0 %v4606_v1 }
 0x33c   :  { %3451 = vmatprep.subr.bf16.mxu1 %v4608_v2 }
 0x33e   :  { %3370 = vmatpush1.bf16.msra.mxu0 %v4605_v13 }
 0x33f   :  { %3452 = vmatpush1.bf16.msra.mxu1 %v4607_v14  ;;  %3371 = vmatprep.subr.bf16.mxu0 %v4614_v15  ;;  %v5140_v14 = vld [vmem:[#allocation7 + $0x100] sm:$0xff]  }
 0x340   :  { %3453 = vmatprep.subr.bf16.mxu1 %v4616_v16 }
 0x342   :  { %3372 = vmatpush1.bf16.msra.mxu0 %v4613_v18  ;;  %v5142_v18 = vld [vmem:[#allocation7 + $0x148] sm:$0xff]  }
 0x343   :  { %3454 = vmatpush1.bf16.msra.mxu1 %v4615_v20  ;;  %4682 = vmatprep.subr.bf16.mxu0 %v5106_v21  ;;  %v5143_v20 = vld [vmem:[#allocation7 + $0x1c8] sm:$0xff]  }
 0x344   :  { %4704 = vmatprep.subr.bf16.mxu1 %v5107_v22  ;;  %v5144_v21 = vld [vmem:[#allocation7 + $0x108] sm:$0xff]  }
 0x345   :  { %3374 = vmatmul.mubr.bf16.vlgmr.msra.gmra.mrb[12].mxu0 %v5466_v60  ;;  %v5145_v22 = vld [vmem:[#allocation7 + $0x188] sm:$0xff]  }
 0x346   :  { %3456 = vmatmul.mubr.bf16.vlgmr.msra.gmra.mrb[12].mxu1 %v5466_v60  ;;  %4683 = vmatpush3.bf16.msra.mxu0 %v5108_v24  ;;  %v5121_v60 = vld [vmem:[#allocation7 + $0x98] sm:$0xff]   ;;  %v5146_v24 = vld [vmem:[#allocation7 + $0x150] sm:$0xff]  }
 0x347   :  { %4705 = vmatpush3.bf16.msra.mxu1 %v5109_v25  ;;  %4684 = vmatprep.subr.bf16.mxu0 %v5110_v36  ;;  %v5147_v25 = vld [vmem:[#allocation7 + $0x1d0] sm:$0xff]  }
 0x348   :  { %4706 = vmatprep.subr.bf16.mxu1 %v5111_v26  ;;  %v5148_v36 = vld [vmem:[#allocation7 + $0x110] sm:$0xff]  }
 0x349   :  { %v5149_v26 = vld [vmem:[#allocation7 + $0x190] sm:$0xff]  }
 0x34a   :  { %4685 = vmatpush3.bf16.msra.mxu0 %v5112_v27  ;;  %v5150_v27 = vld [vmem:[#allocation7 + $0x158] sm:$0xff]  }
 0x34b   :  { %4707 = vmatpush3.bf16.msra.mxu1 %v5113_v28  ;;  %4686 = vmatprep.subr.bf16.mxu0 %v5114_v29  ;;  %v5151_v28 = vld [vmem:[#allocation7 + $0x1d8] sm:$0xff]  }
 0x34c   :  { %4708 = vmatprep.subr.bf16.mxu1 %v5115_v30  ;;  %v5152_v29 = vld [vmem:[#allocation7 + $0x118] sm:$0xff]  }
 0x34d   :  { %v5153_v30 = vld [vmem:[#allocation7 + $0x198] sm:$0xff]  }
 0x34e   :  { %4687 = vmatpush3.bf16.msra.mxu0 %v5116_v31  ;;  %v5154_v31 = vld [vmem:[#allocation7 + $0x160] sm:$0xff]  }
 0x34f   :  { %4709 = vmatpush3.bf16.msra.mxu1 %v5117_v32  ;;  %4688 = vmatprep.subr.bf16.mxu0 %v5118_v33  ;;  %v5155_v32 = vld [vmem:[#allocation7 + $0x1e0] sm:$0xff]  }
 0x350   :  { %4710 = vmatprep.subr.bf16.mxu1 %v5119_v35  ;;  %v5156_v33 = vld [vmem:[#allocation7 + $0x120] sm:$0xff]  }
 0x351   :  { %v5157_v35 = vld [vmem:[#allocation7 + $0x1a0] sm:$0xff]  }
 0x352   :  { %4689 = vmatpush3.bf16.msra.mxu0 %v5120_v38  ;;  %v5158_v38 = vld [vmem:[#allocation7 + $0x168] sm:$0xff]  }
 0x353   :  { %4711 = vmatpush3.bf16.msra.mxu1 %v5121_v60  ;;  %4690 = vmatprep.subr.bf16.mxu0 %v5122_v37  ;;  %v5159_v60 = vld [vmem:[#allocation7 + $0x1e8] sm:$0xff]  }
 0x354   :  { %4712 = vmatprep.subr.bf16.mxu1 %v5123_v39  ;;  %v5160_v37 = vld [vmem:[#allocation7 + $0x128] sm:$0xff]  }
 0x355   :  { %v5161_v39 = vld [vmem:[#allocation7 + $0x1a8] sm:$0xff]  }
 0x356   :  { %4691 = vmatpush3.bf16.msra.mxu0 %v5124_v41  ;;  %v5162_v41 = vld [vmem:[#allocation7 + $0x170] sm:$0xff]  }
 0x357   :  { %4713 = vmatpush3.bf16.msra.mxu1 %v5125_v3  ;;  %4692 = vmatprep.subr.bf16.mxu0 %v5126_v17  ;;  %v5163_v3 = vld [vmem:[#allocation7 + $0x1f0] sm:$0xff]  }
 0x358   :  { %4714 = vmatprep.subr.bf16.mxu1 %v5127_v8  ;;  %v5164_v17 = vld [vmem:[#allocation7 + $0x130] sm:$0xff]  }
 0x359   :  { %v5165_v8 = vld [vmem:[#allocation7 + $0x1b0] sm:$0xff]  }
 0x35a   :  { %4693 = vmatpush3.bf16.msra.mxu0 %v5128_v19  ;;  %v5166_v19 = vld [vmem:[#allocation7 + $0x178] sm:$0xff]  }
 0x35b   :  { %4715 = vmatpush3.bf16.msra.mxu1 %v5129_v42  ;;  %4694 = vmatprep.subr.bf16.mxu0 %v5130_v49  ;;  %v5167_v42 = vld [vmem:[#allocation7 + $0x1f8] sm:$0xff]  }
 0x35c   :  { %4716 = vmatprep.subr.bf16.mxu1 %v5131_v44  ;;  %v5168_v49 = vld [vmem:[#allocation7 + $0x138] sm:$0xff]  }
 0x35d   :  { %v5169_v44 = vld [vmem:[#allocation7 + $0x1b8] sm:$0xff]  }
 0x35e   :  { %4695 = vmatpush3.bf16.msra.mxu0 %v5132_v45  ;;  %v1834_v45 = vsub.s32 4, %v5388_v6 }
 0x35f   :  { %4717 = vmatpush3.bf16.msra.mxu1 %v5133_v46  ;;  %4696 = vmatprep.subr.bf16.mxu0 %v5134_v40  ;;  %v1842_v46 = vsub.s32 6, %v5388_v6  ;;  %v1838_v40 = vsub.s32 5, %v5388_v6 }
 0x360   :  { %4718 = vmatprep.subr.bf16.mxu1 %v5135_v47  ;;  %v1846_v47 = vsub.s32 7, %v5388_v6 }
 0x362   :  { %4697 = vmatpush3.bf16.msra.mxu0 %v5136_v12  ;;  %v1835_v12 = vrot.slane %v5481_v52, %v1834_v45 }
 0x363   :  { %4719 = vmatpush3.bf16.msra.mxu1 %v5137_v48  ;;  %4726 = vmatprep.subr.bf16.mxu0 %v5138_v50  ;;  %v1843_v48 = vrot.slane %v5481_v52, %v1842_v46  ;;  %v1839_v50 = vrot.slane %v5481_v52, %v1838_v40 }
 0x364   :  { %4748 = vmatprep.subr.bf16.mxu1 %v5139_v51  ;;  %v1847_v51 = vrot.slane %v5481_v52, %v1846_v47 }
 0x398   :  { %v3211_v57 = vpop.f32.mrb[8].mxu0  ;;  %v3293_v58 = vpop.f32.mrb[8].mxu1 }
 0x399   :  { %v4774_v59 = vadd.f32 %v3211_v57, %v1819_v53  ;;  %v4776_v61 = vadd.f32 %v3293_v58, %v1827_v54  ;;  %v3213_v62 = vpop.f32.mrb[9].mxu0  ;;  %v3295_v63 = vpop.f32.mrb[9].mxu1 }
 0x39a   :  { %v4775_v0 = vadd.f32 %v3213_v62, %v1823_v55  ;;  %v4777_v43 = vadd.f32 %v3295_v63, %v1831_v56  ;;  %v3215_v1 = vpop.f32.mrb[10].mxu0  ;;  %v3297_v2 = vpop.f32.mrb[10].mxu1 }
 0x39b   :  { %v3464_v7 = vmax.f32 %v4774_v59, 0.0  ;;  %v3466_v4 = vmax.f32 %v4776_v61, 0.0  ;;  %v3216_v5 = vpop.f32.mrb[11].mxu0  ;;  %v3298_v23 = vpop.f32.mrb[11].mxu1 }
 0x39c   :  { %v3465_v10 = vmax.f32 %v4775_v0, 0.0  ;;  %v3467_v11 = vmax.f32 %v4777_v43, 0.0 }
 0x39d   :  { %v3472_v15 = vpack.c.bf16 %v3464_v7, %v3464_v7  ;;  %v3474_v16 = vpack.c.bf16 %v3466_v4, %v3466_v4 }
 0x39e   :  { %v3473_v9 = vpack.c.bf16 %v3465_v10, %v3465_v10  ;;  %v3475_v13 = vpack.c.bf16 %v3467_v11, %v3467_v11 }
 0x3a0   :  { %4031 = vmatprep.mubr.bf16.mxu0 %v3473_v9  ;;  %4071 = vmatprep.mubr.bf16.mxu1 %v3475_v13  ;;  %v4617_v9 = vld [vmem:[%s5513_s8] ss:$0 sm:$0xff] }
 0x3a1   :  { %4032 = vmatmul.mubr.bf16.vlgmr.msra.gmra.mrb[16].mxu0 %v3472_v15  ;;  %4072 = vmatmul.mubr.bf16.vlgmr.msra.gmra.mrb[16].mxu1 %v3474_v16 }
 0x3a2   :  { %4727 = vmatpush3.bf16.msra.mxu0 %v5140_v14  ;;  %4749 = vmatpush3.bf16.msra.mxu1 %v5141_v34 }
 0x3a3   :  { %4728 = vmatprep.subr.bf16.mxu0 %v5142_v18  ;;  %4750 = vmatprep.subr.bf16.mxu1 %v5143_v20 }
 0x3a6   :  { %4729 = vmatpush3.bf16.msra.mxu0 %v5144_v21  ;;  %4751 = vmatpush3.bf16.msra.mxu1 %v5145_v22 }
 0x3a7   :  { %4730 = vmatprep.subr.bf16.mxu0 %v5146_v24  ;;  %4752 = vmatprep.subr.bf16.mxu1 %v5147_v25 }
 0x3aa   :  { %4731 = vmatpush3.bf16.msra.mxu0 %v5148_v36  ;;  %4753 = vmatpush3.bf16.msra.mxu1 %v5149_v26 }
 0x3ab   :  { %4732 = vmatprep.subr.bf16.mxu0 %v5150_v27  ;;  %4754 = vmatprep.subr.bf16.mxu1 %v5151_v28 }
 0x3ae   :  { %4733 = vmatpush3.bf16.msra.mxu0 %v5152_v29  ;;  %4755 = vmatpush3.bf16.msra.mxu1 %v5153_v30 }
 0x3af   :  { %4734 = vmatprep.subr.bf16.mxu0 %v5154_v31  ;;  %4756 = vmatprep.subr.bf16.mxu1 %v5155_v32 }
 0x3b2   :  { %4735 = vmatpush3.bf16.msra.mxu0 %v5156_v33  ;;  %4757 = vmatpush3.bf16.msra.mxu1 %v5157_v35 }
 0x3b3   :  { %4736 = vmatprep.subr.bf16.mxu0 %v5158_v38  ;;  %4758 = vmatprep.subr.bf16.mxu1 %v5159_v60 }
 0x3b6   :  { %4737 = vmatpush3.bf16.msra.mxu0 %v5160_v37  ;;  %4759 = vmatpush3.bf16.msra.mxu1 %v5161_v39 }
 0x3b7   :  { %4738 = vmatprep.subr.bf16.mxu0 %v5162_v41  ;;  %4760 = vmatprep.subr.bf16.mxu1 %v5163_v3 }
 0x3ba   :  { %4739 = vmatpush3.bf16.msra.mxu0 %v5164_v17  ;;  %4761 = vmatpush3.bf16.msra.mxu1 %v5165_v8 }
 0x3bb   :  { %4740 = vmatprep.subr.bf16.mxu0 %v5166_v19  ;;  %4762 = vmatprep.subr.bf16.mxu1 %v5167_v42 }
 0x3be   :  { %4741 = vmatpush3.bf16.msra.mxu0 %v5168_v49  ;;  %4763 = vmatpush3.bf16.msra.mxu1 %v5169_v44 }
 0x418   :  { %v3375_v53 = vpop.f32.mrb[12].mxu0 }
 0x419   :  { %v4778_v54 = vadd.f32 %v3375_v53, %v1835_v12  ;;  %v3457_v55 = vpop.f32.mrb[12].mxu1  ;;  %v3377_v56 = vpop.f32.mrb[13].mxu0 }
 0x41a   :  { %v4780_v57 = vadd.f32 %v3457_v55, %v1843_v48  ;;  %v4779_v58 = vadd.f32 %v3377_v56, %v1839_v50  ;;  %v3459_v59 = vpop.f32.mrb[13].mxu1  ;;  %v3379_v61 = vpop.f32.mrb[14].mxu0 }
 0x41b   :  { %v3468_v62 = vmax.f32 %v4778_v54, 0.0  ;;  %v4781_v63 = vadd.f32 %v3459_v59, %v1847_v51  ;;  %v3461_v0 = vpop.f32.mrb[14].mxu1  ;;  %v3380_v6 = vpop.f32.mrb[15].mxu0 }
 0x41c   :  { %v3470_v43 = vmax.f32 %v4780_v57, 0.0  ;;  %v3469_v1 = vmax.f32 %v4779_v58, 0.0  ;;  %v3462_v2 = vpop.f32.mrb[15].mxu1 }
 0x41d   :  { %v3471_v7 = vmax.f32 %v4781_v63, 0.0  ;;  %v3476_v5 = vpack.c.bf16 %v3468_v62, %v3468_v62 }
 0x41e   :  { %v3477_v4 = vpack.c.bf16 %v3469_v1, %v3469_v1  ;;  %v3478_v52 = vpack.c.bf16 %v3470_v43, %v3470_v43 }
 0x41f   :  { %v3479_v23 = vpack.c.bf16 %v3471_v7, %v3471_v7 }
 0x420   :  { %4111 = vmatprep.mubr.bf16.mxu0 %v3477_v4 }
 0x421   :  { %4151 = vmatprep.mubr.bf16.mxu1 %v3479_v23  ;;  %4112 = vmatmul.mubr.bf16.vlgmr.msra.gmra.mrb[20].mxu0 %v3476_v5 }
 0x422   :  { %4152 = vmatmul.mubr.bf16.vlgmr.msra.gmra.mrb[20].mxu1 %v3478_v52 }
 0x474   :  { %v4698_v10 = vpop.f32.mrb[16].mxu0  ;;  %v4720_v11 = vpop.f32.mrb[16].mxu1 }
 0x475   :  { %v4699_v13 = vpop.f32.mrb[17].mxu0  ;;  %v4721_v14 = vpop.f32.mrb[17].mxu1 }
 0x476   :  { %v4700_v34 = vadd.f32 %v4699_v13, %v4698_v10  ;;  %v4722_v15 = vadd.f32 %v4721_v14, %v4720_v11  ;;  %v4701_v16 = vpop.f32.mrb[18].mxu0  ;;  %v4723_v18 = vpop.f32.mrb[18].mxu1 }
 0x477   :  { %v4702_v20 = vpop.f32.mrb[19].mxu0  ;;  %v4724_v21 = vpop.f32.mrb[19].mxu1 }
 0x478   :  { %v4034_v22 = vadd.f32 %v4700_v34, %v4617_v9 }
 0x47a   :  { %v4074_v24 = vadd.f32 %v4722_v15, %v4034_v22 }
 0x4f4   :  { %v4742_v25 = vpop.f32.mrb[20].mxu0 }
 0x4f5   :  { %v4764_v36 = vpop.f32.mrb[20].mxu1  ;;  %v4743_v26 = vpop.f32.mrb[21].mxu0 }
 0x4f6   :  { %v4744_v27 = vadd.f32 %v4743_v26, %v4742_v25  ;;  %v4765_v28 = vpop.f32.mrb[21].mxu1  ;;  %v4745_v29 = vpop.f32.mrb[22].mxu0 }
 0x4f7   :  { %v4766_v30 = vadd.f32 %v4765_v28, %v4764_v36  ;;  %v4767_v31 = vpop.f32.mrb[22].mxu1  ;;  %v4746_v32 = vpop.f32.mrb[23].mxu0 }
 0x4f8   :  { %v4114_v33 = vadd.f32 %v4744_v27, %v4074_v24  ;;  %v4768_v35 = vpop.f32.mrb[23].mxu1 }
 0x4fa   :  { %v4154_v38 = vadd.f32 %v4766_v30, %v4114_v33 }
 0x4fc   :  { %4159 = vst [vmem:[%s5514_s9] sm:$0xff] %v4154_v38 }
 0x4fd   :  { %4164 = vsyncpa [#allocation3], 1 }
 0x4fe   :  { %4165 = vsyncpa [#allocation5], 1 }
 0x4ff   :  { %4166 = vsyncpa [#allocation8], 1 }

</bundles_post_ra>
